<compile_context>
chip_gen: v7x
topology: tpu7x:2x2x1
jax: 0.10.0
libtpu: 0.0.40
codegen_flags: <defaults>
</compile_context>

<pallas_src>
import functools

import jax
import jax.numpy as jnp
from jax.experimental import pallas as pl
from jax.experimental.pallas import tpu as pltpu

_LANE = 128


# ---------------------------------------------------------------------------
# Kernel: one (bb, th) block of 2x2x2 / stride-2 max pooling.
#   x_ref: (bb, 2, th, 4*Wo)   (N*C*Dout rows, d-parity, h_out, [h-parity x 2*Wo])
#   o_ref: (bb, th, Wo)
# ---------------------------------------------------------------------------
def _maxpool3d_2x2x2_kernel(x_ref, o_ref, *, chunk_rows):
    bb, th, wo = o_ref.shape
    two_wo = 2 * wo
    n_chunks = bb // chunk_rows

    # Exact 0/1 selection matrices picking even / odd lanes (w-parity).
    row = jax.lax.broadcasted_iota(jnp.int32, (two_wo, wo), 0)
    col2 = 2 * jax.lax.broadcasted_iota(jnp.int32, (two_wo, wo), 1)
    sel_even = (row == col2).astype(jnp.float32)
    sel_odd = (row == col2 + 1).astype(jnp.float32)

    def process(start):
        # depth-window max: d-parity is a major (integer-indexed) dim.
        m = jnp.maximum(
            x_ref[pl.ds(start, chunk_rows), 0],
            x_ref[pl.ds(start, chunk_rows), 1],
        )                                                    # (cb, th, 4*Wo)
        # height-window max: h-even / h-odd rows are contiguous lane halves.
        m = jnp.maximum(m[..., :two_wo], m[..., two_wo:])    # (cb, th, 2*Wo)
        # width-window max: lanes interleave w-even/w-odd; pick each parity
        # with an exact 0/1 selection matmul (idle MXU) and take the maximum.
        m = m.reshape(chunk_rows * th, two_wo).astype(jnp.float32)
        res = jnp.maximum(
            jnp.dot(m, sel_even, preferred_element_type=jnp.float32,
                    precision=jax.lax.Precision.HIGHEST),
            jnp.dot(m, sel_odd, preferred_element_type=jnp.float32,
                    precision=jax.lax.Precision.HIGHEST),
        )                                                    # (cb*th, Wo)
        o_ref[pl.ds(start, chunk_rows)] = (
            res.reshape(chunk_rows, th, wo).astype(o_ref.dtype))

    if n_chunks == 1:
        process(0)
    else:
        def body(i, carry):
            process(pl.multiple_of(i * chunk_rows, chunk_rows))
            return carry

        jax.lax.fori_loop(0, n_chunks, body, 0)


# ---------------------------------------------------------------------------
# Block / tile selection (generation-aware VMEM budget)
# ---------------------------------------------------------------------------
def _round_up(v, m):
    return -(-v // m) * m


def _sublane_multiple(itemsize):
    # f32 -> 8, bf16 -> 16, int8/fp8 -> 32 rows per sublane tile.
    return 8 * max(1, 4 // itemsize)


def _divisors_desc(n):
    return [d for d in range(n, 0, -1) if n % d == 0]


def _vmem_capacity_bytes():
    try:
        info = pltpu.get_tpu_info()
        cap = getattr(info, "vmem_capacity_bytes", None)
        if cap:
            return int(cap)
    except Exception:
        pass
    return 64 << 20  # conservative (v7x-sized) default if detection fails


def _pick_tiles(B, Ho, Wo, itemsize):
    sub = _sublane_multiple(itemsize)

    def in_bytes(bb, th):   # padded VMEM footprint of one input block buffer
        return bb * 2 * _round_up(th, sub) * _round_up(4 * Wo, _LANE) * itemsize

    def out_bytes(bb, th):
        return bb * _round_up(th, sub) * _round_up(Wo, _LANE) * itemsize

    def pipeline_bytes(bb, th):  # input and output are both double-buffered
        return 2 * (in_bytes(bb, th) + out_bytes(bb, th))

    cap = _vmem_capacity_bytes()
    budget = max(min(int(cap * 0.45), 72 << 20), 8 << 20)
    chunk_cap = 1 << 20  # per-inner-iteration compute working set (bounds spills)

    # h tile: largest divisor of Ho that is a multiple of 8 (or Ho itself, which
    # is always a legal block extent) whose single-row slab fits the chunk cap.
    divs_ho = _divisors_desc(Ho)
    th_cands = sorted({d for d in divs_ho if d % 8 == 0} | {Ho}, reverse=True)
    th = None
    for cand in th_cands:
        if in_bytes(1, cand) <= chunk_cap and pipeline_bytes(1, cand) <= budget:
            th = cand
            break
    if th is None:
        th = th_cands[-1]

    # batch (N*C*Dout) tile: largest divisor of B fitting the VMEM budget.
    bb = 1
    for d in _divisors_desc(B):
        if pipeline_bytes(d, th) <= budget:
            bb = d
            break

    # keep >= 2 grid steps along a parallel axis when possible (v7x megacore).
    if B // bb < 2 and Ho // th < 2 and B > 1:
        for d in _divisors_desc(B):
            if d < bb:
                bb = d
                break

    # compute chunk: rows of the block processed per inner iteration.
    cbb = 1
    for d in _divisors_desc(bb):
        if in_bytes(d, th) <= chunk_cap:
            cbb = d
            break

    used = pipeline_bytes(bb, th) + (8 << 20)  # + compute-scratch headroom
    vmem_limit = int(min(cap * 0.94, max(used, 32 << 20)))
    vmem_limit = max(vmem_limit, used)
    return bb, th, cbb, vmem_limit


# ---------------------------------------------------------------------------
# Forward pass
# ---------------------------------------------------------------------------
def maxpool3d_2x2x2(x):
    """x: (N, C, D, H, W) NCDHW -> (N, C, D//2, H//2, W//2), floor mode."""
    N, C, D, H, W = x.shape
    Do, Ho, Wo = D // 2, H // 2, W // 2
    if Do == 0 or Ho == 0 or Wo == 0:
        raise ValueError("MaxPool3d(2): every spatial dim must be >= 2")
    if (D, H, W) != (2 * Do, 2 * Ho, 2 * Wo):
        x = x[:, :, : 2 * Do, : 2 * Ho, : 2 * Wo]  # floor-mode crop

    B = N * C * Do
    # Free contiguous reshape: (N, C, 2Do, 2Ho, 2Wo) -> (B, d-parity, Ho, 4*Wo)
    # where the lane axis packs [h-even row (2Wo) | h-odd row (2Wo)].
    xr = x.reshape(B, 2, Ho, 4 * Wo)

    bb, th, cbb, vmem_limit = _pick_tiles(B, Ho, Wo, x.dtype.itemsize)
    grid = (B // bb, Ho // th)

    kernel = functools.partial(_maxpool3d_2x2x2_kernel, chunk_rows=cbb)
    out = pl.pallas_call(
        kernel,
        out_shape=jax.ShapeDtypeStruct((B, Ho, Wo), x.dtype),
        grid_spec=pltpu.PrefetchScalarGridSpec(
            num_scalar_prefetch=0,
            grid=grid,
            in_specs=[
                pl.BlockSpec((bb, 2, th, 4 * Wo), lambda b, h: (b, 0, h, 0)),
            ],
            out_specs=pl.BlockSpec((bb, th, Wo), lambda b, h: (b, h, 0)),
        ),
        compiler_params=pltpu.CompilerParams(
            dimension_semantics=("parallel", "parallel"),
            vmem_limit_bytes=vmem_limit,
        ),
    )(xr)

    return out.reshape(N, C, Do, Ho, Wo)


def single_down_forward(x):
    """SingleDown.forward == nn.MaxPool3d(kernel_size=2, stride=2)."""
    return maxpool3d_2x2x2(x)


# Pure-JAX reference (silent correctness check).
def _maxpool3d_reference(x):
    N, C, D, H, W = x.shape
    Do, Ho, Wo = D // 2, H // 2, W // 2
    xr = x[:, :, : 2 * Do, : 2 * Ho, : 2 * Wo].reshape(N, C, Do, 2, Ho, 2, Wo, 2)
    return xr.max(axis=(3, 5, 7))


if __name__ == "__main__":
    k1, k2 = jax.random.split(jax.random.PRNGKey(0))
    fwd = jax.jit(single_down_forward)

    # Primary check (module-sized input).
    x = jax.random.normal(k1, (2, 4, 16, 16, 16), dtype=jnp.float32)
    out = jax.block_until_ready(fwd(x))
    ref = _maxpool3d_reference(x)
    assert out.shape == (2, 4, 8, 8, 8), out.shape
    assert jnp.allclose(out, ref, rtol=1e-6, atol=1e-6), float(
        jnp.max(jnp.abs(out - ref)))

    # Secondary check: odd spatial dims exercise the floor-mode crop.
    x2 = jax.random.normal(k2, (1, 3, 9, 17, 12), dtype=jnp.float32)
    out2 = jax.block_until_ready(fwd(x2))
    ref2 = _maxpool3d_reference(x2)
    assert out2.shape == (1, 3, 4, 8, 6), out2.shape
    assert jnp.allclose(out2, ref2, rtol=1e-6, atol=1e-6), float(
        jnp.max(jnp.abs(out2 - ref2)))

    print("KERNEL_OK")
</pallas_src>

<mosaic_0001>
module attributes {stable_mosaic.version = 11 : i64} {
  func.func @_maxpool3d_2x2x2_kernel(%arg0: i32, %arg1: i32, %arg2: memref<32x2x8x32xf32, #tpu.memory_space<vmem>>, %arg3: memref<32x8x8xf32, #tpu.memory_space<vmem>>) attributes {dimension_semantics = [#tpu.dimension_semantics<parallel>, #tpu.dimension_semantics<parallel>], iteration_bounds = array<i64: 2, 1>, scalar_prefetch = 0 : i64, scratch_operands = 0 : i64, tpu.core_type = #tpu.core_type<tc>, window_params = [{transform_indices = @transform_0, window_bounds = array<i64: 32, 2, 8, 32>}, {transform_indices = @transform_1, window_bounds = array<i64: 32, 8, 8>}]} {
    %0 = tpu.iota {dimensions = array<i32: 0>} : vector<16x8xi32>
    %1 = tpu.iota {dimensions = array<i32: 1>} : vector<16x8xi32>
    %c2_i32 = arith.constant 2 : i32
    %2 = vector.broadcast %c2_i32 : i32 to vector<16x8xi32>
    %3 = arith.muli %2, %1 : vector<16x8xi32>
    %4 = arith.cmpi eq, %0, %3 : vector<16x8xi32>
    %5 = arith.extui %4 : vector<16x8xi1> to vector<16x8xi32>
    %6 = arith.sitofp %5 : vector<16x8xi32> to vector<16x8xf32>
    %c1_i32 = arith.constant 1 : i32
    %7 = vector.broadcast %c1_i32 : i32 to vector<16x8xi32>
    %8 = arith.addi %3, %7 : vector<16x8xi32>
    %9 = arith.cmpi eq, %0, %8 : vector<16x8xi32>
    %10 = arith.extui %9 : vector<16x8xi1> to vector<16x8xi32>
    %11 = arith.sitofp %10 : vector<16x8xi32> to vector<16x8xf32>
    %c0 = arith.constant 0 : index
    %c0_0 = arith.constant 0 : index
    %c0_1 = arith.constant 0 : index
    %c0_2 = arith.constant 0 : index
    %12 = vector.load %arg2[%c0, %c0_0, %c0_1, %c0_2] : memref<32x2x8x32xf32, #tpu.memory_space<vmem>>, vector<32x1x8x32xf32>
    %13 = vector.shape_cast %12 : vector<32x1x8x32xf32> to vector<32x8x32xf32>
    %c0_3 = arith.constant 0 : index
    %c1 = arith.constant 1 : index
    %c0_4 = arith.constant 0 : index
    %c0_5 = arith.constant 0 : index
    %14 = vector.load %arg2[%c0_3, %c1, %c0_4, %c0_5] : memref<32x2x8x32xf32, #tpu.memory_space<vmem>>, vector<32x1x8x32xf32>
    %15 = vector.shape_cast %14 : vector<32x1x8x32xf32> to vector<32x8x32xf32>
    %16 = arith.maximumf %13, %15 : vector<32x8x32xf32>
    %17 = vector.extract_strided_slice %16 {offsets = [0, 0, 0], sizes = [32, 8, 16], strides = [1, 1, 1]} : vector<32x8x32xf32> to vector<32x8x16xf32>
    %18 = vector.extract_strided_slice %16 {offsets = [0, 0, 16], sizes = [32, 8, 16], strides = [1, 1, 1]} : vector<32x8x32xf32> to vector<32x8x16xf32>
    %19 = arith.maximumf %17, %18 : vector<32x8x16xf32>
    %20 = vector.shape_cast %19 : vector<32x8x16xf32> to vector<256x16xf32>
    %cst = arith.constant dense<0.000000e+00> : vector<256x8xf32>
    %21 = tpu.matmul %20, %6, %cst {dimension_numbers = #tpu.dot_dimension_numbers<[1], [0], [0], [1], [0, 0, 1, 1], [], []>, precision = #tpu.contract_precision<fp32>} : vector<256x16xf32>, vector<16x8xf32>, vector<256x8xf32> -> vector<256x8xf32>
    %cst_6 = arith.constant dense<0.000000e+00> : vector<256x8xf32>
    %22 = tpu.matmul %20, %11, %cst_6 {dimension_numbers = #tpu.dot_dimension_numbers<[1], [0], [0], [1], [0, 0, 1, 1], [], []>, precision = #tpu.contract_precision<fp32>} : vector<256x16xf32>, vector<16x8xf32>, vector<256x8xf32> -> vector<256x8xf32>
    %23 = arith.maximumf %21, %22 : vector<256x8xf32>
    %24 = vector.shape_cast %23 : vector<256x8xf32> to vector<32x8x8xf32>
    %c0_7 = arith.constant 0 : index
    %c0_8 = arith.constant 0 : index
    %c0_9 = arith.constant 0 : index
    %25 = vector.load %arg3[%c0_7, %c0_8, %c0_9] : memref<32x8x8xf32, #tpu.memory_space<vmem>>, vector<32x8x8xf32>
    tpu.vector_store %arg3[%c0_7, %c0_8, %c0_9], %24 {strides = array<i32>} : memref<32x8x8xf32, #tpu.memory_space<vmem>>, vector<32x8x8xf32>,
    return
  }
  func.func @transform_0(%arg0: i32, %arg1: i32) -> (i32, i32, i32, i32) {
    %c0_i32 = arith.constant 0 : i32
    %c0_i32_0 = arith.constant 0 : i32
    %c0_i32_1 = arith.constant 0 : i32
    return %arg0, %c0_i32, %arg1, %c0_i32_0 : i32, i32, i32, i32
  }
  func.func @transform_1(%arg0: i32, %arg1: i32) -> (i32, i32, i32) {
    %c0_i32 = arith.constant 0 : i32
    %c0_i32_0 = arith.constant 0 : i32
    return %arg0, %arg1, %c0_i32 : i32, i32, i32
  }
}

</mosaic_0001>

<bundles_post_ra>
// kernel: single_down_forward.1
= control target key start
LH: loop header
LB: loop body
LE: loop exit
PB: predicated region body
PF: predicated region fallthrough
CT: control target
= control target key end

     0   :  { %6 = vsyncpa [#allocation3], 0  ;;  %s7110_s0 = inlined_call_operand.vmem [shape: f32[64,2,8,32], index: 0, kind: input, shape index: {}]   ;;  %s7111_s1 = inlined_call_operand.hbm [shape: f32[64,8,8], index: 1, kind: output, shape index: {}]  }
   0x1   :  { %8 = vsyncpa [#allocation3 + $0x1], 0  ;;  %s5881_s6 = smov 0   ;;  %s5883_s7 = smov 0  }
   0x2   :  { %s5885_s8 = smov 0   ;;  %s5887_s9 = smov 0  }
   0x3   :  { %s5889_s10 = smov 0   ;;  %s5891_s11 = smov 0  }
   0x4 LB: > { %s4261_s12 = sadd.s32 4294967295, %s5863_s11   ;;  %s4262_s13 = sadd.s32 4294967294, %s5863_s11   ;;  %s5863_s11 = sphi %s5891_s11, %s14_s11   ;;  %s5859_s10 = sphi %s5889_s10, %s7325_s10   ;;  %s5855_s9 = sphi %s5887_s9, %s7324_s9   ;;  %s5851_s8 = sphi %s5885_s8, %s7323_s8   ;;  %s5847_s7 = sphi %s5883_s7, %s7322_s7   ;;  %s5843_s6 = sphi %s5881_s6, %s7321_s6  }
   0x5   : > { %s26_s14 = sadd.s32 1, %s5859_s10  ;;  %s63_s15 = sadd.s32 1, %s5851_s8 }
   0x6   : > { %p28_p0 = scmp.ge.s32.totalorder %s26_s14, 2  ;;  %p73_p1 = scmp.ne.s32.totalorder %s5851_s8, %s5847_s7 }
   0x7   : > { %p74_p2 = scmp.eq.s32.totalorder %s4261_s12, 1  ;;  %p79_p3 = scmp.ne.s32.totalorder %s5847_s7, %s5843_s6 }
   0x8   : > { %s7327_s14 = smov (%p28_p0, %s26_s14), 0  ;;  %p80_p5 = scmp.eq.s32.totalorder %s4262_s13, 1 }
   0x9   : > { %p5921_p4 = por %p74_p2, %p73_p1  ;;  %s58_s17 = ssub.s32 %s5859_s10, %s7327_s14 }
   0xa   : > { %p4265_p6 = scmp.ge.s32.totalorder %s5863_s11, 1  ;;  %p61_p7 = scmp.eq.s32.totalorder %s58_s17, 0 }
   0xb   : > { %p5928_p8 = por %p80_p5, %p79_p3  ;;  %p111_p9 = scmp.lt.s32.totalorder %s5863_s11, 3 }
   0xc   : > { %s5934_s19 = scalar_select %p61_p7, %s5851_s8, %s63_s15  }
   0xd   : > { %p112_p10 = pnand %p4265_p6, %p111_p9 }
   0xf   : > { %115 = sbr.rel (%p112_p10) target bundleno = 774 (0x306), region = 24 }
  0x16   : > { %s4267_s20 = sshll.u32 %s5855_s9, 5  ;;  %v146_v0 = vlaneseq  ;;  %s5865_s25 = smov 112   ;;  %v5866_v28 = vmov 0.0   ;;  %vm422_vm6 = vcmask 130048   ;;  %vm4135_vm7 = vcmask 64512  }
  0x17   : > { %p136_p11 = scmp.lt.s32.totalorder %s4267_s20, 63  ;;  %s132_s26 = sand.u32 1, %s5847_s7  }
  0x18   : > { %v150_v1 = vand.u32 127, %v146_v0  ;;  %v5945_v5 = vshrl.u32 %v146_v0, 7  ;;  %s4266_s27 = sshll.u32 %s132_s26, 8  ;;  %s4324_s29 = sshll.u32 %s5855_s9, 12 }
  0x19   : > { %s7329_s20 = smov (!%p136_p11, %s4267_s20), 63  ;;  %s6987_s28 = scalar_lea.vmem [#allocation2], %s4266_s27 }
  0x1a   : > { %s4323_s21 = sshll.u32 %s7329_s20, 4  ;;  %v5947_v6 = vmul.u32 2, %v150_v1  ;;  %v5969_v18 = vadd.s32 8, %v5945_v5  ;;  %s4183_s30 = sshll.u32 %s6987_s28, 4  ;;  %s7056_s30 = int_to_ptr.vmem [resolvable:$true] %s4183_s30 }
  0x1b   : > { %s5940_s24 = scalar_lea.vmem %s7110_s0, %s4323_s21  ;;  %s7054_s4 = scalar_lea.hbm %s7111_s1, %s4324_s29 }
  0x1c   : > { %v167_v2 = vld [vmem:[%s5940_s24 + $0x20] sm:$0xff]  ;;  %v4276_v3 = vld [vmem:[%s5940_s24 + $0x28] sm:$0xff]  ;;  %v168_v9 = vld [vmem:[%s5940_s24 + $0x30] sm:$0xff]  ;;  %v5972_v19 = vadd.s32 1, %v5947_v6  ;;  %vm152_vm0 = vcmp.eq.s32.totalorder %v5945_v5, %v5947_v6  ;;  %vm153_vm1 = vcmp.eq.s32.totalorder %v5969_v18, %v5947_v6  ;;  %s7064_s5 = scalar_lea.sflag [#allocation3], %s132_s26  ;;  %s5785_s9 = scalar_lea.vmem %s7056_s30, 4096 }
  0x1d   : > { %v165_v4 = vld [vmem:[%s5940_s24] sm:$0xff]  ;;  %v5949_v7 = vmax.f32 %v167_v2, %v4276_v3  ;;  %v4274_v8 = vld [vmem:[%s5940_s24 + $0x8] sm:$0xff]  ;;  %v4277_v10 = vld [vmem:[%s5940_s24 + $0x38] sm:$0xff]  ;;  %v4270_v29 = vsel %vm152_vm0, 1.0, %v5866_v28  ;;  %v4271_v30 = vsel %vm153_vm1, 1.0, %v5866_v28  ;;  %p5786_p12 = scmp.ne.s32.totalorder %s7056_s30, %s5785_s9  ;;  %s5868_s12 = smov [#allocation2]  }
  0x1e   : > { %v5954_v11 = vmax.f32 %v165_v4, %v4274_v8  ;;  %v166_v12 = vld [vmem:[%s5940_s24 + $0x10] sm:$0xff]  ;;  %v4275_v13 = vld [vmem:[%s5940_s24 + $0x18] sm:$0xff]  ;;  %v5960_v14 = vmax.f32 %v168_v9, %v4277_v10  ;;  %v169_v20 = vld [vmem:[%s5940_s24 + $0x40] sm:$0xff]  ;;  %vm159_vm2 = vcmp.eq.s32.totalorder %v5945_v5, %v5972_v19  ;;  %v6003_v32 = vsub.f32 %v4270_v29, %v4270_v29  ;;  %s5789_s13 = sshll.u32 %s5868_s12, 4  ;;  %s5790_s13 = int_to_ptr.vmem [resolvable:$false] %s5789_s13 }
  0x1f   : > { %298 = vrot.lane.b32.xlu1 %v5949_v7, %s5865_s25  ;;  %v5964_v15 = vmax.f32 %v166_v12, %v4275_v13  ;;  %v170_v16 = vld [vmem:[%s5940_s24 + $0x50] sm:$0xff]  ;;  %v4279_v17 = vld [vmem:[%s5940_s24 + $0x58] sm:$0xff]  ;;  %v4278_v21 = vld [vmem:[%s5940_s24 + $0x48] sm:$0xff]  ;;  %v4272_v31 = vsel %vm159_vm2, 1.0, %v5866_v28  ;;  %v6005_v33 = vsub.f32 %v4271_v30, %v4271_v30  ;;  %vm160_vm3 = vcmp.eq.s32.totalorder %v5969_v18, %v5972_v19  ;;  %p5787_p13 = pnand %p5786_p12, %p5921_p4  ;;  %s5791_s15 = scalar_lea.vmem %s5790_s13, 8192 }
  0x20   : > { %294 = vrot.lane.b32.xlu0 %v5954_v11, %s5865_s25  ;;  %v5978_v22 = vmax.f32 %v170_v16, %v4279_v17  ;;  %v5984_v23 = vmax.f32 %v169_v20, %v4278_v21  ;;  %v172_v24 = vld [vmem:[%s5940_s24 + $0x70] sm:$0xff]  ;;  %v4281_v25 = vld [vmem:[%s5940_s24 + $0x78] sm:$0xff]  ;;  %v171_v26 = vld [vmem:[%s5940_s24 + $0x60] sm:$0xff]  ;;  %v4273_v35 = vsel %vm160_vm3, 1.0, %v5866_v28  ;;  %v6016_v36 = vsub.f32 %v4272_v31, %v4272_v31  ;;  %p5792_p1 = scmp.lt.s32.totalorder %s7056_s30, %s5790_s13  ;;  %p5793_p2 = scmp.lt.s32.totalorder %s5791_s15, %s5785_s9 }
  0x21   : > { %v4280_v27 = vld [vmem:[%s5940_s24 + $0x68] sm:$0xff]  ;;  %v6011_v34 = vmax.f32 %v172_v24, %v4281_v25  ;;  %v174_v38 = vld [vmem:[%s5940_s24 + $0x90] sm:$0xff]  ;;  %v4283_v39 = vld [vmem:[%s5940_s24 + $0x98] sm:$0xff]  ;;  %v6024_v40 = vsub.f32 %v4273_v35, %v4273_v35  ;;  %v7115_v41 = vand.u32 4294901760, %v6003_v32  ;;  %v7114_v44 = vand.u32 4294901760, %v6005_v33  ;;  %p5788_p0 = pneg %p5787_p13 }
  0x22   : > { %v6020_v37 = vmax.f32 %v171_v26, %v4280_v27  ;;  %v173_v42 = vld [vmem:[%s5940_s24 + $0x80] sm:$0xff]  ;;  %v4282_v43 = vld [vmem:[%s5940_s24 + $0x88] sm:$0xff]  ;;  %v7113_v45 = vand.u32 4294901760, %v6016_v36  ;;  %v6037_v48 = vmax.f32 %v174_v38, %v4283_v39  ;;  %v176_v52 = vld [vmem:[%s5940_s24 + $0xb0] sm:$0xff]  ;;  %v7116_v8 = vmov 1.0|1.0   ;;  %p5794_p3 = por %p5793_p2, %p5792_p1 }
  0x23   : > { %300 = vrot.lane.b32.xlu1 %v5960_v14, %s5865_s25  ;;  %v910_v46 = vsub.f32 %v6003_v32, %v7115_v41  ;;  %v7112_v47 = vand.u32 4294901760, %v6024_v40  ;;  %v917_v49 = vsub.f32 %v6005_v33, %v7114_v44  ;;  %v6047_v51 = vmax.f32 %v173_v42, %v4282_v43  ;;  %v4285_v53 = vld [vmem:[%s5940_s24 + $0xb8] sm:$0xff]  ;;  %v175_v55 = vld [vmem:[%s5940_s24 + $0xa0] sm:$0xff]  ;;  %v4284_v56 = vld [vmem:[%s5940_s24 + $0xa8] sm:$0xff] }
  0x24   : > { %296 = vrot.lane.b32.xlu0 %v5964_v15, %s5865_s25  ;;  %v2702_v50 = vsub.f32 %v6016_v36, %v7113_v45  ;;  %v6058_v61 = vmax.f32 %v176_v52, %v4285_v53  ;;  %v6062_v62 = vmax.f32 %v175_v55, %v4284_v56  ;;  %v178_v63 = vld [vmem:[%s5940_s24 + $0xd0] sm:$0xff]  ;;  %v4287_v0 = vld [vmem:[%s5940_s24 + $0xd8] sm:$0xff]  ;;  %v177_v1 = vld [vmem:[%s5940_s24 + $0xc0] sm:$0xff]  ;;  %p5795_p5 = pnand %p5794_p3, %p5788_p0 }
  0x25   : > { %v2709_v54 = vsub.f32 %v6024_v40, %v7112_v47  ;;  %v911_v57 = vand.u32 4294901760, %v910_v46  ;;  %v918_v58 = vand.u32 4294901760, %v917_v49  ;;  %v4286_v2 = vld [vmem:[%s5940_s24 + $0xc8] sm:$0xff]  ;;  %vm6074_vm4 = vmpackc.low %vm153_vm1, %vm152_vm0  ;;  %v6097_v10 = vmax.f32 %v178_v63, %v4287_v0  ;;  %v180_v12 = vld [vmem:[%s5940_s24 + $0xf0] sm:$0xff] }
  0x26   : > { %v2703_v59 = vand.u32 4294901760, %v2702_v50  ;;  %5358 = vmatprep.subr.msk.bf16.mxu0 %vm6074_vm4, %v7116_v8  ;;  %vm6089_vm5 = vmpackc.low %vm160_vm3, %vm159_vm2  ;;  %v6104_v5 = vmax.f32 %v177_v1, %v4286_v2  ;;  %v4289_v13 = vld [vmem:[%s5940_s24 + $0xf8] sm:$0xff]  ;;  %v179_v16 = vld [vmem:[%s5940_s24 + $0xe0] sm:$0xff] }
  0x27   : > { %304 = vrot.lane.b32.xlu1 %v5978_v22, %s5865_s25  ;;  %v2710_v60 = vand.u32 4294901760, %v2709_v54  ;;  %v6078_v4 = vpack.c.bf16 %v918_v58, %v911_v57  ;;  %5382 = vmatprep.subr.msk.bf16.mxu1 %vm6089_vm5, %v7116_v8  ;;  %v4288_v17 = vld [vmem:[%s5940_s24 + $0xe8] sm:$0xff]  ;;  %v6120_v18 = vmax.f32 %v180_v12, %v4289_v13  ;;  %v182_v20 = vld [vmem:[%s5940_s24 + $0x110] sm:$0xff]  ;;  %v4291_v21 = vld [vmem:[%s5940_s24 + $0x118] sm:$0xff] }
  0x28   : > { %302 = vrot.lane.b32.xlu0 %v5984_v23, %s5865_s25  ;;  %5360 = vmatpush3.bf16.msk.msra.mxu0 %vm6074_vm4, %v7116_v8  ;;  %v6124_v19 = vmax.f32 %v179_v16, %v4288_v17  ;;  %v181_v24 = vld [vmem:[%s5940_s24 + $0x100] sm:$0xff]  ;;  %v4290_v25 = vld [vmem:[%s5940_s24 + $0x108] sm:$0xff]  ;;  %v6132_v26 = vmax.f32 %v182_v20, %v4291_v21  ;;  %v184_v28 = vld [vmem:[%s5940_s24 + $0x130] sm:$0xff] }
  0x29   : > { %v6093_v9 = vpack.c.bf16 %v2710_v60, %v2703_v59  ;;  %5384 = vmatpush3.bf16.msk.msra.mxu1 %vm6089_vm5, %v7116_v8  ;;  %5362 = vmatprep.subr.bf16.mxu0 %v6078_v4  ;;  %v6136_v27 = vmax.f32 %v181_v24, %v4290_v25  ;;  %v4293_v29 = vld [vmem:[%s5940_s24 + $0x138] sm:$0xff]  ;;  %v183_v30 = vld [vmem:[%s5940_s24 + $0x120] sm:$0xff]  ;;  %v4292_v31 = vld [vmem:[%s5940_s24 + $0x128] sm:$0xff] }
  0x2a   : > { %v6144_v35 = vmax.f32 %v184_v28, %v4293_v29  ;;  %v6148_v38 = vmax.f32 %v183_v30, %v4292_v31  ;;  %v186_v39 = vld [vmem:[%s5940_s24 + $0x150] sm:$0xff]  ;;  %v4295_v42 = vld [vmem:[%s5940_s24 + $0x158] sm:$0xff]  ;;  %v185_v43 = vld [vmem:[%s5940_s24 + $0x140] sm:$0xff] }
  0x2b   : > { %308 = vrot.lane.b32.xlu1 %v6011_v34, %s5865_s25  ;;  %5386 = vmatprep.subr.bf16.mxu1 %v6093_v9  ;;  %v4294_v46 = vld [vmem:[%s5940_s24 + $0x148] sm:$0xff]  ;;  %v6156_v49 = vmax.f32 %v186_v39, %v4295_v42  ;;  %v188_v52 = vld [vmem:[%s5940_s24 + $0x170] sm:$0xff]  ;;  %v4297_v53 = vld [vmem:[%s5940_s24 + $0x178] sm:$0xff] }
  0x2c   : > { %306 = vrot.lane.b32.xlu0 %v6020_v37, %s5865_s25  ;;  %v6160_v50 = vmax.f32 %v185_v43, %v4294_v46  ;;  %v187_v54 = vld [vmem:[%s5940_s24 + $0x160] sm:$0xff]  ;;  %v4296_v55 = vld [vmem:[%s5940_s24 + $0x168] sm:$0xff]  ;;  %v6168_v56 = vmax.f32 %v188_v52, %v4297_v53  ;;  %v190_v58 = vld [vmem:[%s5940_s24 + $0x190] sm:$0xff]  ;;  %v6228_v53 = vpack.c.bf16 %v6005_v33, %v6003_v32 }
  0x2d   : > { %v6172_v57 = vmax.f32 %v187_v54, %v4296_v55  ;;  %v4299_v59 = vld [vmem:[%s5940_s24 + $0x198] sm:$0xff]  ;;  %v189_v60 = vld [vmem:[%s5940_s24 + $0x180] sm:$0xff]  ;;  %v4298_v63 = vld [vmem:[%s5940_s24 + $0x188] sm:$0xff]  ;;  %v6232_v54 = vpack.c.bf16 %v6024_v40, %v6016_v36 }
  0x2e   : > { %v6180_v0 = vmax.f32 %v190_v58, %v4299_v59  ;;  %v6184_v1 = vmax.f32 %v189_v60, %v4298_v63  ;;  %v192_v2 = vld [vmem:[%s5940_s24 + $0x1b0] sm:$0xff]  ;;  %v4301_v12 = vld [vmem:[%s5940_s24 + $0x1b8] sm:$0xff]  ;;  %v191_v13 = vld [vmem:[%s5940_s24 + $0x1a0] sm:$0xff] }
  0x2f   : > { %312 = vrot.lane.b32.xlu1 %v6037_v48, %s5865_s25  ;;  %v4300_v16 = vld [vmem:[%s5940_s24 + $0x1a8] sm:$0xff]  ;;  %v6192_v17 = vmax.f32 %v192_v2, %v4301_v12  ;;  %v194_v21 = vld [vmem:[%s5940_s24 + $0x1d0] sm:$0xff]  ;;  %v4303_v24 = vld [vmem:[%s5940_s24 + $0x1d8] sm:$0xff] }
  0x30   : > { %310 = vrot.lane.b32.xlu0 %v6047_v51, %s5865_s25  ;;  %v6196_v20 = vmax.f32 %v191_v13, %v4300_v16  ;;  %v193_v25 = vld [vmem:[%s5940_s24 + $0x1c0] sm:$0xff]  ;;  %v4302_v28 = vld [vmem:[%s5940_s24 + $0x1c8] sm:$0xff]  ;;  %v6204_v29 = vmax.f32 %v194_v21, %v4303_v24  ;;  %v196_v31 = vld [vmem:[%s5940_s24 + $0x1f0] sm:$0xff] }
  0x31   : > { %v6208_v30 = vmax.f32 %v193_v25, %v4302_v28  ;;  %v4305_v39 = vld [vmem:[%s5940_s24 + $0x1f8] sm:$0xff]  ;;  %v195_v42 = vld [vmem:[%s5940_s24 + $0x1e0] sm:$0xff]  ;;  %v4304_v43 = vld [vmem:[%s5940_s24 + $0x1e8] sm:$0xff] }
  0x32   : > { %v6216_v46 = vmax.f32 %v196_v31, %v4305_v39  ;;  %v6220_v52 = vmax.f32 %v195_v42, %v4304_v43 }
  0x33   : > { %316 = vrot.lane.b32.xlu1 %v6058_v61, %s5865_s25 }
  0x34   : > { %314 = vrot.lane.b32.xlu0 %v6062_v62, %s5865_s25 }
  0x37   : > { %320 = vrot.lane.b32.xlu1 %v6097_v10, %s5865_s25 }
  0x38   : > { %318 = vrot.lane.b32.xlu0 %v6104_v5, %s5865_s25 }
  0x3b   : > { %324 = vrot.lane.b32.xlu1 %v6120_v18, %s5865_s25 }
  0x3c   : > { %322 = vrot.lane.b32.xlu0 %v6124_v19, %s5865_s25 }
  0x3f   : > { %328 = vrot.lane.b32.xlu1 %v6132_v26, %s5865_s25 }
  0x40   : > { %326 = vrot.lane.b32.xlu0 %v6136_v27, %s5865_s25 }
  0x43   : > { %332 = vrot.lane.b32.xlu1 %v6144_v35, %s5865_s25 }
  0x44   : > { %330 = vrot.lane.b32.xlu0 %v6148_v38, %s5865_s25 }
  0x47   : > { %336 = vrot.lane.b32.xlu1 %v6156_v49, %s5865_s25 }
  0x48   : > { %334 = vrot.lane.b32.xlu0 %v6160_v50, %s5865_s25 }
  0x4b   : > { %340 = vrot.lane.b32.xlu1 %v6168_v56, %s5865_s25 }
  0x4c   : > { %338 = vrot.lane.b32.xlu0 %v6172_v57, %s5865_s25 }
  0x4f   : > { %344 = vrot.lane.b32.xlu1 %v6180_v0, %s5865_s25 }
  0x50   : > { %342 = vrot.lane.b32.xlu0 %v6184_v1, %s5865_s25 }
  0x53   : > { %348 = vrot.lane.b32.xlu1 %v6192_v17, %s5865_s25 }
  0x54   : > { %346 = vrot.lane.b32.xlu0 %v6196_v20, %s5865_s25 }
  0x57   : > { %352 = vrot.lane.b32.xlu1 %v6204_v29, %s5865_s25 }
  0x58   : > { %350 = vrot.lane.b32.xlu0 %v6208_v30, %s5865_s25 }
  0x5b   : > { %356 = vrot.lane.b32.xlu1 %v6216_v46, %s5865_s25 }
  0x5c   : > { %354 = vrot.lane.b32.xlu0 %v6220_v52, %s5865_s25 }
  0x91   : > { %v299_v55 = vpop.permute.xlu1 %298 }
  0x92   : > { %v392_v58 = vmax.f32 %v5949_v7, %v299_v55  ;;  %v295_v59 = vpop.permute.xlu0 %294 }
  0x93   : > { %v390_v60 = vmax.f32 %v5954_v11, %v295_v59 }
  0x94   : > { %v430_v63 = vsel %vm422_vm6, %v392_v58, 0 }
  0x95   : > { %v6237_v2 = vand.u32 4294901760, %v430_v63  ;;  %v424_v12 = vsel %vm422_vm6, %v390_v60, 0  ;;  %v301_v13 = vpop.permute.xlu1 %300 }
  0x96   : > { %v6240_v16 = vand.u32 4294901760, %v424_v12  ;;  %v393_v21 = vmax.f32 %v5960_v14, %v301_v13  ;;  %v297_v24 = vpop.permute.xlu0 %296 }
  0x97   : > { %v6244_v25 = vsub.f32 %v430_v63, %v6237_v2  ;;  %v391_v7 = vmax.f32 %v5964_v15, %v297_v24 }
  0x98   : > { %v6248_v28 = vsub.f32 %v424_v12, %v6240_v16  ;;  %v433_v11 = vsel %vm422_vm6, %v393_v21, 0 }
  0x99   : > { %v6251_v31 = vand.u32 4294901760, %v433_v11  ;;  %v427_v39 = vsel %vm422_vm6, %v391_v7, 0  ;;  %v305_v42 = vpop.permute.xlu1 %304  ;;  %v6265_v60 = vand.u32 4294901760, %v6244_v25 }
  0x9a   : > { %v6254_v43 = vand.u32 4294901760, %v427_v39  ;;  %v395_v14 = vmax.f32 %v5978_v22, %v305_v42  ;;  %v303_v55 = vpop.permute.xlu0 %302  ;;  %v6258_v58 = vand.u32 4294901760, %v6248_v28 }
  0x9b   : > { %v6261_v15 = vsub.f32 %v433_v11, %v6251_v31  ;;  %v394_v59 = vmax.f32 %v5984_v23, %v303_v55  ;;  %7222 = vst [vmem:[#allocation7_spill] sm:$0xff] %v6265_v60 }
  0x9c   : > { %7220 = vst [vmem:[#allocation5_spill] sm:$0xff] %v6258_v58  ;;  %v6268_v63 = vsub.f32 %v427_v39, %v6254_v43  ;;  %v439_v12 = vsel %vm422_vm6, %v395_v14, 0  ;;  %v589_v22 = vsub.f32 %v6248_v28, %v6258_v58 }
  0x9d   : > { %7221 = vst [vmem:[#allocation6_spill] sm:$0xff] %v6261_v15  ;;  %v6273_v13 = vand.u32 4294901760, %v439_v12  ;;  %v436_v21 = vsel %vm422_vm6, %v394_v59, 0  ;;  %v309_v24 = vpop.permute.xlu1 %308  ;;  %v6277_v7 = vand.u32 4294901760, %v6261_v15  ;;  %v609_v59 = vsub.f32 %v6244_v25, %v6265_v60 }
  0x9e   : > { %v6279_v23 = vand.u32 4294901760, %v436_v21  ;;  %v397_v11 = vmax.f32 %v6011_v34, %v309_v24  ;;  %v307_v42 = vpop.permute.xlu0 %306  ;;  %v590_v39 = vand.u32 4294901760, %v589_v22  ;;  %v6283_v55 = vand.u32 4294901760, %v6268_v63 }
  0x9f   : > { %7223 = vst [vmem:[#allocation8_spill] sm:$0xff] %v6277_v7  ;;  %v6286_v14 = vsub.f32 %v439_v12, %v6273_v13  ;;  %v396_v47 = vmax.f32 %v6020_v37, %v307_v42  ;;  %v619_v22 = vsub.f32 %v6261_v15, %v6277_v7 }
  0xa0   : > { %7224 = vst [vmem:[#allocation9_spill] sm:$0xff] %v6283_v55  ;;  %v6292_v45 = vsub.f32 %v436_v21, %v6279_v23  ;;  %v445_v44 = vsel %vm422_vm6, %v397_v11, 0  ;;  %4737 = vmatprep.mubr.f32.mxu0 %v590_v39  ;;  %5049 = vmatprep.mubr.f32.mxu1 %v590_v39  ;;  %v599_v34 = vsub.f32 %v6268_v63, %v6283_v55  ;;  %v610_v55 = vand.u32 4294901760, %v609_v59 }
  0xa1   : > { %v6299_v12 = vand.u32 4294901760, %v445_v44  ;;  %v442_v37 = vsel %vm422_vm6, %v396_v47, 0  ;;  %v313_v24 = vpop.permute.xlu1 %312  ;;  %v6303_v42 = vand.u32 4294901760, %v6286_v14  ;;  %v620_v15 = vand.u32 4294901760, %v619_v22 }
  0xa2   : > { %v6305_v21 = vand.u32 4294901760, %v442_v37  ;;  %v399_v11 = vmax.f32 %v6037_v48, %v313_v24  ;;  %v311_v41 = vpop.permute.xlu0 %310  ;;  %v600_v39 = vand.u32 4294901760, %v599_v34  ;;  %v6309_v8 = vand.u32 4294901760, %v6292_v45 }
  0xa3   : > { %7225 = vst [vmem:[#allocation10_spill] sm:$0xff] %v6303_v42  ;;  %v6312_v60 = vsub.f32 %v445_v44, %v6299_v12  ;;  %v398_v7 = vmax.f32 %v6047_v51, %v311_v41  ;;  %v639_v44 = vsub.f32 %v6286_v14, %v6303_v42 }
  0xa4   : > { %7226 = vst [vmem:[#allocation11_spill] sm:$0xff] %v6309_v8  ;;  %v6316_v47 = vsub.f32 %v442_v37, %v6305_v21  ;;  %v451_v58 = vsel %vm422_vm6, %v399_v11, 0  ;;  %4738 = vmatmul.mubr.f32.vlgmr.msra.gmra.mrb[0].mxu0 %v600_v39  ;;  %5050 = vmatmul.mubr.f32.vlgmr.msra.gmra.mrb[0].mxu1 %v600_v39  ;;  %v629_v48 = vsub.f32 %v6292_v45, %v6309_v8 }
  0xa5   : > { %7227 = vst [vmem:[#allocation12_spill] sm:$0xff] %v6312_v60  ;;  %v6321_v34 = vand.u32 4294901760, %v451_v58  ;;  %v448_v24 = vsel %vm422_vm6, %v398_v7, 0  ;;  %5364 = vmatpush3.bf16.msra.mxu0 %v6078_v4  ;;  %5388 = vmatpush3.bf16.msra.mxu1 %v6093_v9  ;;  %v317_v41 = vpop.permute.xlu1 %316  ;;  %v6329_v51 = vand.u32 4294901760, %v6312_v60 }
  0xa6   : > { %v6331_v59 = vand.u32 4294901760, %v448_v24  ;;  %4740 = vmatprep.mubr.f32.mxu0 %v610_v55  ;;  %5052 = vmatprep.mubr.f32.mxu1 %v610_v55  ;;  %v401_v22 = vmax.f32 %v6058_v61, %v317_v41  ;;  %v315_v37 = vpop.permute.xlu0 %314  ;;  %v630_v11 = vand.u32 4294901760, %v629_v48  ;;  %v6335_v7 = vand.u32 4294901760, %v6316_v47 }
  0xa7   : > { %7228 = vst [vmem:[#allocation13_spill] sm:$0xff] %v6329_v51  ;;  %v6338_v4 = vsub.f32 %v451_v58, %v6321_v34  ;;  %v400_v9 = vmax.f32 %v6062_v62, %v315_v37  ;;  %5366 = vmatprep.subr.bf16.mxu0 %v6228_v53  ;;  %5390 = vmatprep.subr.bf16.mxu1 %v6232_v54  ;;  %v640_v37 = vand.u32 4294901760, %v639_v44 }
  0xa8   : > { %7229 = vst [vmem:[#allocation14_spill] sm:$0xff] %v6335_v7  ;;  %v6344_v39 = vsub.f32 %v448_v24, %v6331_v59  ;;  %v457_v55 = vsel %vm422_vm6, %v401_v22, 0  ;;  %4741 = vmatmul.mubr.f32.gmra.mrb[2].mxu0 %v620_v15  ;;  %5053 = vmatmul.mubr.f32.gmra.mrb[2].mxu1 %v620_v15  ;;  %v649_v61 = vsub.f32 %v6316_v47, %v6335_v7 }
  0xa9   : > { %7230 = vst [vmem:[#allocation15_spill] sm:$0xff] %v6338_v4  ;;  %v659_v58 = vsub.f32 %v6312_v60, %v6329_v51  ;;  %v6351_v48 = vand.u32 4294901760, %v457_v55  ;;  %v454_v62 = vsel %vm422_vm6, %v400_v9, 0  ;;  %4743 = vmatprep.mubr.f32.mxu0 %v630_v11  ;;  %5055 = vmatprep.mubr.f32.mxu1 %v630_v11  ;;  %v321_v41 = vpop.permute.xlu1 %320  ;;  %v6355_v24 = vand.u32 4294901760, %v6338_v4 }
  0xaa   : > { %7231 = vst [vmem:[#allocation16_spill] sm:$0xff] %v6344_v39  ;;  %v6357_v22 = vand.u32 4294901760, %v454_v62  ;;  %v403_v15 = vmax.f32 %v6097_v10, %v321_v41  ;;  %v319_v42 = vpop.permute.xlu0 %318  ;;  %v650_v7 = vand.u32 4294901760, %v649_v61  ;;  %v6361_v8 = vand.u32 4294901760, %v6344_v39 }
  0xab   : > { %7232 = vst [vmem:[#allocation17_spill] sm:$0xff] %v6355_v24  ;;  %v6364_v51 = vsub.f32 %v457_v55, %v6351_v48  ;;  %v402_v9 = vmax.f32 %v6104_v5, %v319_v42  ;;  %v660_v60 = vand.u32 4294901760, %v659_v58  ;;  %v679_v5 = vsub.f32 %v6338_v4, %v6355_v24 }
  0xac   : > { %7233 = vst [vmem:[#allocation18_spill] sm:$0xff] %v6361_v8  ;;  %v6368_v11 = vsub.f32 %v454_v62, %v6357_v22  ;;  %v463_v44 = vsel %vm422_vm6, %v403_v15, 0  ;;  %4744 = vmatmul.mubr.f32.gmra.mrb[4].mxu0 %v640_v37  ;;  %5056 = vmatmul.mubr.f32.gmra.mrb[4].mxu1 %v640_v37  ;;  %v669_v10 = vsub.f32 %v6344_v39, %v6361_v8 }
  0xad   : > { %7234 = vst [vmem:[#allocation19_spill] sm:$0xff] %v6364_v51  ;;  %v6373_v61 = vand.u32 4294901760, %v463_v44  ;;  %v460_v41 = vsel %vm422_vm6, %v402_v9, 0  ;;  %4746 = vmatprep.mubr.f32.mxu0 %v650_v7  ;;  %5058 = vmatprep.mubr.f32.mxu1 %v650_v7  ;;  %v325_v55 = vpop.permute.xlu1 %324  ;;  %v6379_v42 = vand.u32 4294901760, %v6364_v51 }
  0xae   : > { %7235 = vst [vmem:[#allocation20_spill] sm:$0xff] %v6368_v11  ;;  %v6381_v62 = vand.u32 4294901760, %v460_v41  ;;  %v405_v58 = vmax.f32 %v6120_v18, %v325_v55  ;;  %v323_v37 = vpop.permute.xlu0 %322  ;;  %v670_v15 = vand.u32 4294901760, %v669_v10  ;;  %v6385_v8 = vand.u32 4294901760, %v6368_v11 }
  0xaf   : > { %7236 = vst [vmem:[#allocation21_spill] sm:$0xff] %v6379_v42  ;;  %v6388_v9 = vsub.f32 %v463_v44, %v6373_v61  ;;  %v404_v7 = vmax.f32 %v6124_v19, %v323_v37  ;;  %v699_v10 = vsub.f32 %v6364_v51, %v6379_v42  ;;  %v680_v37 = vand.u32 4294901760, %v679_v5 }
  0xb0   : > { %7237 = vst [vmem:[#allocation22_spill] sm:$0xff] %v6385_v8  ;;  %v6392_v39 = vsub.f32 %v460_v41, %v6381_v62  ;;  %v469_v24 = vsel %vm422_vm6, %v405_v58, 0  ;;  %4747 = vmatmul.mubr.f32.gmra.mrb[6].mxu0 %v660_v60  ;;  %5059 = vmatmul.mubr.f32.gmra.mrb[6].mxu1 %v660_v60  ;;  %v689_v18 = vsub.f32 %v6368_v11, %v6385_v8 }
  0xb1   : > { %7238 = vst [vmem:[#allocation23_spill] sm:$0xff] %v6388_v9  ;;  %v6399_v55 = vand.u32 4294901760, %v469_v24  ;;  %v466_v44 = vsel %vm422_vm6, %v404_v7, 0  ;;  %4749 = vmatprep.mubr.f32.mxu0 %v670_v15  ;;  %5061 = vmatprep.mubr.f32.mxu1 %v670_v15  ;;  %v329_v19 = vpop.permute.xlu1 %328  ;;  %v6403_v41 = vand.u32 4294901760, %v6388_v9  ;;  %v700_v51 = vand.u32 4294901760, %v699_v10 }
  0xb2   : > { %7239 = vst [vmem:[#allocation24_spill] sm:$0xff] %v6392_v39  ;;  %v6405_v58 = vand.u32 4294901760, %v466_v44  ;;  %v407_v60 = vmax.f32 %v6132_v26, %v329_v19  ;;  %v327_v4 = vpop.permute.xlu0 %326  ;;  %v690_v8 = vand.u32 4294901760, %v689_v18  ;;  %v6409_v11 = vand.u32 4294901760, %v6392_v39 }
  0xb3   : > { %7240 = vst [vmem:[#allocation25_spill] sm:$0xff] %v6403_v41  ;;  %v6412_v42 = vsub.f32 %v469_v24, %v6399_v55  ;;  %v406_v7 = vmax.f32 %v6136_v27, %v327_v4  ;;  %v719_v27 = vsub.f32 %v6388_v9, %v6403_v41 }
  0xb4   : > { %7241 = vst [vmem:[#allocation26_spill] sm:$0xff] %v6409_v11  ;;  %v6416_v15 = vsub.f32 %v466_v44, %v6405_v58  ;;  %v475_v5 = vsel %vm422_vm6, %v407_v60, 0  ;;  %4750 = vmatmul.mubr.f32.gmra.mrb[8].mxu0 %v680_v37  ;;  %5062 = vmatmul.mubr.f32.gmra.mrb[8].mxu1 %v680_v37  ;;  %v709_v26 = vsub.f32 %v6392_v39, %v6409_v11 }
  0xb5   : > { %7242 = vst [vmem:[#allocation27_spill] sm:$0xff] %v6412_v42  ;;  %v6421_v18 = vand.u32 4294901760, %v475_v5  ;;  %v472_v19 = vsel %vm422_vm6, %v406_v7, 0  ;;  %4752 = vmatprep.mubr.f32.mxu0 %v690_v8  ;;  %5064 = vmatprep.mubr.f32.mxu1 %v690_v8  ;;  %v333_v24 = vpop.permute.xlu1 %332  ;;  %v6427_v4 = vand.u32 4294901760, %v6412_v42 }
  0xb6   : > { %7243 = vst [vmem:[#allocation28_spill] sm:$0xff] %v6416_v15  ;;  %v6429_v44 = vand.u32 4294901760, %v472_v19  ;;  %v409_v10 = vmax.f32 %v6144_v35, %v333_v24  ;;  %v331_v37 = vpop.permute.xlu0 %330  ;;  %v710_v60 = vand.u32 4294901760, %v709_v26  ;;  %v6433_v11 = vand.u32 4294901760, %v6416_v15 }
  0xb7   : > { %7244 = vst [vmem:[#allocation29_spill] sm:$0xff] %v6427_v4  ;;  %v6436_v7 = vsub.f32 %v475_v5, %v6421_v18  ;;  %v408_v8 = vmax.f32 %v6148_v38, %v331_v37  ;;  %v739_v26 = vsub.f32 %v6412_v42, %v6427_v4  ;;  %v720_v37 = vand.u32 4294901760, %v719_v27 }
  0xb8   : > { %7245 = vst [vmem:[#allocation30_spill] sm:$0xff] %v6433_v11  ;;  %v6440_v39 = vsub.f32 %v472_v19, %v6429_v44  ;;  %v481_v41 = vsel %vm422_vm6, %v409_v10, 0  ;;  %4753 = vmatmul.mubr.f32.gmra.mrb[10].mxu0 %v700_v51  ;;  %5065 = vmatmul.mubr.f32.gmra.mrb[10].mxu1 %v700_v51  ;;  %v729_v35 = vsub.f32 %v6416_v15, %v6433_v11 }
  0xb9   : > { %7246 = vst [vmem:[#allocation31_spill] sm:$0xff] %v6436_v7  ;;  %v6447_v24 = vand.u32 4294901760, %v481_v41  ;;  %v478_v5 = vsel %vm422_vm6, %v408_v8, 0  ;;  %4755 = vmatprep.mubr.f32.mxu0 %v710_v60  ;;  %5067 = vmatprep.mubr.f32.mxu1 %v710_v60  ;;  %v337_v38 = vpop.permute.xlu1 %336  ;;  %v6451_v19 = vand.u32 4294901760, %v6436_v7  ;;  %v740_v42 = vand.u32 4294901760, %v739_v26 }
  0xba   : > { %7247 = vst [vmem:[#allocation32_spill] sm:$0xff] %v6440_v39  ;;  %v6453_v10 = vand.u32 4294901760, %v478_v5  ;;  %v411_v51 = vmax.f32 %v6156_v49, %v337_v38  ;;  %v335_v9 = vpop.permute.xlu0 %334  ;;  %v730_v11 = vand.u32 4294901760, %v729_v35  ;;  %v6457_v15 = vand.u32 4294901760, %v6440_v39 }
  0xbb   : > { %7248 = vst [vmem:[#allocation33_spill] sm:$0xff] %v6451_v19  ;;  %v6460_v4 = vsub.f32 %v481_v41, %v6447_v24  ;;  %v410_v8 = vmax.f32 %v6160_v50, %v335_v9  ;;  %v759_v50 = vsub.f32 %v6436_v7, %v6451_v19 }
  0xbc   : > { %7249 = vst [vmem:[#allocation34_spill] sm:$0xff] %v6457_v15  ;;  %v6464_v60 = vsub.f32 %v478_v5, %v6453_v10  ;;  %v487_v27 = vsel %vm422_vm6, %v411_v51, 0  ;;  %4756 = vmatmul.mubr.f32.gmra.mrb[12].mxu0 %v720_v37  ;;  %5068 = vmatmul.mubr.f32.gmra.mrb[12].mxu1 %v720_v37  ;;  %v749_v49 = vsub.f32 %v6440_v39, %v6457_v15 }
  0xbd   : > { %7250 = vst [vmem:[#allocation35_spill] sm:$0xff] %v6460_v4  ;;  %v6469_v35 = vand.u32 4294901760, %v487_v27  ;;  %v484_v38 = vsel %vm422_vm6, %v410_v8, 0  ;;  %4758 = vmatprep.mubr.f32.mxu0 %v730_v11  ;;  %5070 = vmatprep.mubr.f32.mxu1 %v730_v11  ;;  %v341_v41 = vpop.permute.xlu1 %340  ;;  %v6475_v9 = vand.u32 4294901760, %v6460_v4 }
  0xbe   : > { %7251 = vst [vmem:[#allocation36_spill] sm:$0xff] %v6464_v60  ;;  %v6477_v5 = vand.u32 4294901760, %v484_v38  ;;  %v413_v26 = vmax.f32 %v6168_v56, %v341_v41  ;;  %v339_v37 = vpop.permute.xlu0 %338  ;;  %v750_v51 = vand.u32 4294901760, %v749_v49  ;;  %v6481_v15 = vand.u32 4294901760, %v6464_v60 }
  0xbf   : > { %7252 = vst [vmem:[#allocation37_spill] sm:$0xff] %v6475_v9  ;;  %v6484_v8 = vsub.f32 %v487_v27, %v6469_v35  ;;  %v412_v11 = vmax.f32 %v6172_v57, %v339_v37  ;;  %v779_v49 = vsub.f32 %v6460_v4, %v6475_v9  ;;  %v760_v37 = vand.u32 4294901760, %v759_v50 }
  0xc0   : > { %7253 = vst [vmem:[#allocation38_spill] sm:$0xff] %v6481_v15  ;;  %v6488_v39 = vsub.f32 %v484_v38, %v6477_v5  ;;  %v493_v19 = vsel %vm422_vm6, %v413_v26, 0  ;;  %4759 = vmatmul.mubr.f32.gmra.mrb[14].mxu0 %v740_v42  ;;  %5071 = vmatmul.mubr.f32.gmra.mrb[14].mxu1 %v740_v42  ;;  %v769_v56 = vsub.f32 %v6464_v60, %v6481_v15 }
  0xc1   : > { %7254 = vst [vmem:[#allocation39_spill] sm:$0xff] %v6484_v8  ;;  %v6495_v41 = vand.u32 4294901760, %v493_v19  ;;  %v490_v27 = vsel %vm422_vm6, %v412_v11, 0  ;;  %4761 = vmatprep.mubr.f32.mxu0 %v750_v51  ;;  %5073 = vmatprep.mubr.f32.mxu1 %v750_v51  ;;  %v345_v57 = vpop.permute.xlu1 %344  ;;  %v6499_v38 = vand.u32 4294901760, %v6484_v8  ;;  %v780_v4 = vand.u32 4294901760, %v779_v49 }
  0xc2   : > { %7255 = vst [vmem:[#allocation40_spill] sm:$0xff] %v6488_v39  ;;  %v6501_v26 = vand.u32 4294901760, %v490_v27  ;;  %v415_v42 = vmax.f32 %v6180_v0, %v345_v57  ;;  %v343_v7 = vpop.permute.xlu0 %342  ;;  %v770_v15 = vand.u32 4294901760, %v769_v56  ;;  %v6505_v60 = vand.u32 4294901760, %v6488_v39 }
  0xc3   : > { %7256 = vst [vmem:[#allocation41_spill] sm:$0xff] %v6499_v38  ;;  %v6508_v9 = vsub.f32 %v493_v19, %v6495_v41  ;;  %v414_v11 = vmax.f32 %v6184_v1, %v343_v7  ;;  %v799_v1 = vsub.f32 %v6484_v8, %v6499_v38 }
  0xc4   : > { %7257 = vst [vmem:[#allocation42_spill] sm:$0xff] %v6505_v60  ;;  %v6512_v51 = vsub.f32 %v490_v27, %v6501_v26  ;;  %v499_v50 = vsel %vm422_vm6, %v415_v42, 0  ;;  %4762 = vmatmul.mubr.f32.gmra.mrb[16].mxu0 %v760_v37  ;;  %5074 = vmatmul.mubr.f32.gmra.mrb[16].mxu1 %v760_v37  ;;  %v789_v0 = vsub.f32 %v6488_v39, %v6505_v60 }
  0xc5   : > { %7258 = vst [vmem:[#allocation43_spill] sm:$0xff] %v6508_v9  ;;  %v6517_v56 = vand.u32 4294901760, %v499_v50  ;;  %v496_v57 = vsel %vm422_vm6, %v414_v11, 0  ;;  %4764 = vmatprep.mubr.f32.mxu0 %v770_v15  ;;  %5076 = vmatprep.mubr.f32.mxu1 %v770_v15  ;;  %v349_v19 = vpop.permute.xlu1 %348  ;;  %v6523_v7 = vand.u32 4294901760, %v6508_v9 }
  0xc6   : > { %7259 = vst [vmem:[#allocation44_spill] sm:$0xff] %v6512_v51  ;;  %v6525_v27 = vand.u32 4294901760, %v496_v57  ;;  %v417_v49 = vmax.f32 %v6192_v17, %v349_v19  ;;  %v347_v37 = vpop.permute.xlu0 %346  ;;  %v790_v42 = vand.u32 4294901760, %v789_v0  ;;  %v6529_v60 = vand.u32 4294901760, %v6512_v51 }
  0xc7   : > { %7260 = vst [vmem:[#allocation45_spill] sm:$0xff] %v6523_v7  ;;  %v6532_v11 = vsub.f32 %v499_v50, %v6517_v56  ;;  %v416_v15 = vmax.f32 %v6196_v20, %v347_v37  ;;  %v819_v0 = vsub.f32 %v6508_v9, %v6523_v7  ;;  %v800_v37 = vand.u32 4294901760, %v799_v1 }
  0xc8   : > { %7261 = vst [vmem:[#allocation46_spill] sm:$0xff] %v6529_v60  ;;  %v6536_v39 = vsub.f32 %v496_v57, %v6525_v27  ;;  %v505_v38 = vsel %vm422_vm6, %v417_v49, 0  ;;  %4765 = vmatmul.mubr.f32.gmra.mrb[18].mxu0 %v780_v4  ;;  %5077 = vmatmul.mubr.f32.gmra.mrb[18].mxu1 %v780_v4  ;;  %v809_v17 = vsub.f32 %v6512_v51, %v6529_v60 }
  0xc9   : > { %v6543_v19 = vand.u32 4294901760, %v505_v38  ;;  %v502_v50 = vsel %vm422_vm6, %v416_v15, 0  ;;  %4767 = vmatprep.mubr.f32.mxu0 %v790_v42  ;;  %5079 = vmatprep.mubr.f32.mxu1 %v790_v42  ;;  %v353_v20 = vpop.permute.xlu1 %352  ;;  %v6547_v57 = vand.u32 4294901760, %v6532_v11  ;;  %v820_v9 = vand.u32 4294901760, %v819_v0 }
  0xca   : > { %7262 = vst [vmem:[#allocation47_spill] sm:$0xff] %v6536_v39  ;;  %v6549_v49 = vand.u32 4294901760, %v502_v50  ;;  %v419_v4 = vmax.f32 %v6204_v29, %v353_v20  ;;  %v351_v8 = vpop.permute.xlu0 %350  ;;  %v810_v60 = vand.u32 4294901760, %v809_v17  ;;  %v6553_v51 = vand.u32 4294901760, %v6536_v39 }
  0xcb   : > { %7263 = vst [vmem:[#allocation48_spill] sm:$0xff] %v6547_v57  ;;  %v6556_v7 = vsub.f32 %v505_v38, %v6543_v19  ;;  %v418_v15 = vmax.f32 %v6208_v30, %v351_v8  ;;  %v839_v30 = vsub.f32 %v6532_v11, %v6547_v57 }
  0xcc   : > { %7264 = vst [vmem:[#allocation49_spill] sm:$0xff] %v6553_v51  ;;  %v6560_v42 = vsub.f32 %v502_v50, %v6549_v49  ;;  %v511_v1 = vsel %vm422_vm6, %v419_v4, 0  ;;  %4768 = vmatmul.mubr.f32.gmra.mrb[20].mxu0 %v800_v37  ;;  %5080 = vmatmul.mubr.f32.gmra.mrb[20].mxu1 %v800_v37  ;;  %v829_v29 = vsub.f32 %v6536_v39, %v6553_v51 }
  0xcd   : > { %7265 = vst [vmem:[#allocation50_spill] sm:$0xff] %v6556_v7  ;;  %v6565_v17 = vand.u32 4294901760, %v511_v1  ;;  %v508_v20 = vsel %vm422_vm6, %v418_v15, 0  ;;  %4770 = vmatprep.mubr.f32.mxu0 %v810_v60  ;;  %5082 = vmatprep.mubr.f32.mxu1 %v810_v60  ;;  %v357_v38 = vpop.permute.xlu1 %356  ;;  %v6571_v8 = vand.u32 4294901760, %v6556_v7 }
  0xce   : > { %v6573_v50 = vand.u32 4294901760, %v508_v20  ;;  %v421_v0 = vmax.f32 %v6216_v46, %v357_v38  ;;  %v355_v37 = vpop.permute.xlu0 %354  ;;  %v830_v4 = vand.u32 4294901760, %v829_v29  ;;  %v6577_v51 = vand.u32 4294901760, %v6560_v42 }
  0xcf   : > { %7266 = vst [vmem:[#allocation51_spill] sm:$0xff] %v6571_v8  ;;  %v6580_v15 = vsub.f32 %v511_v1, %v6565_v17  ;;  %v420_v60 = vmax.f32 %v6220_v52, %v355_v37  ;;  %v840_v1 = vand.u32 4294901760, %v839_v30  ;;  %v859_v52 = vsub.f32 %v6556_v7, %v6571_v8 }
  0xd0   : > { %7267 = vst [vmem:[#allocation52_spill] sm:$0xff] %v6577_v51  ;;  %v6584_v39 = vsub.f32 %v508_v20, %v6573_v50  ;;  %v517_v57 = vsel %vm422_vm6, %v421_v0, 0  ;;  %4771 = vmatmul.mubr.f32.gmra.mrb[22].mxu0 %v820_v9  ;;  %5083 = vmatmul.mubr.f32.gmra.mrb[22].mxu1 %v820_v9  ;;  %v849_v46 = vsub.f32 %v6560_v42, %v6577_v51 }
  0xd1   : > { %v6589_v38 = vand.u32 4294901760, %v517_v57  ;;  %v514_v29 = vsel %vm422_vm6, %v420_v60, 0  ;;  %4773 = vmatprep.mubr.f32.mxu0 %v830_v4  ;;  %5085 = vmatprep.mubr.f32.mxu1 %v830_v4  ;;  %v6600_v9 = vand.u32 4294901760, %v6580_v15  ;;  %v860_v4 = vand.u32 4294901760, %v859_v52 }
  0xd2   : > { %v6594_v37 = vand.u32 4294901760, %v514_v29  ;;  %v850_v20 = vand.u32 4294901760, %v849_v46  ;;  %v6597_v0 = vand.u32 4294901760, %v6584_v39 }
  0xd3   : > { %v6603_v51 = vsub.f32 %v517_v57, %v6589_v38  ;;  %v879_v8 = vsub.f32 %v6580_v15, %v6600_v9 }
  0xd4   : > { %v6606_v60 = vsub.f32 %v514_v29, %v6594_v37  ;;  %4774 = vmatmul.mubr.f32.gmra.mrb[24].mxu0 %v840_v1  ;;  %5086 = vmatmul.mubr.f32.gmra.mrb[24].mxu1 %v840_v1  ;;  %v869_v30 = vsub.f32 %v6584_v39, %v6597_v0 }
  0xd5   : > { %4776 = vmatprep.mubr.f32.mxu0 %v850_v20  ;;  %5088 = vmatprep.mubr.f32.mxu1 %v850_v20  ;;  %v6616_v57 = vand.u32 4294901760, %v6603_v51  ;;  %v880_v1 = vand.u32 4294901760, %v879_v8  ;;  %v7268_v8 = vmov 1.0|1.0  }
  0xd6   : > { %v870_v46 = vand.u32 4294901760, %v869_v30  ;;  %v6613_v7 = vand.u32 4294901760, %v6606_v60 }
  0xd7   : > { %v899_v52 = vsub.f32 %v6603_v51, %v6616_v57 }
  0xd8   : > { %4777 = vmatmul.mubr.f32.gmra.mrb[26].mxu0 %v860_v4  ;;  %5089 = vmatmul.mubr.f32.gmra.mrb[26].mxu1 %v860_v4  ;;  %v889_v29 = vsub.f32 %v6606_v60, %v6613_v7 }
  0xd9   : > { %4779 = vmatprep.mubr.f32.mxu0 %v870_v46  ;;  %5091 = vmatprep.mubr.f32.mxu1 %v870_v46  ;;  %v900_v30 = vand.u32 4294901760, %v899_v52  ;;  %v7271_v46 = vand.u32 4294901760, %v6016_v36  ;;  %v7275_v36 = vld [vmem:[#allocation16_spill] sm:$0xff]  ;;  %v7284_v52 = vld [vmem:[#allocation31_spill] sm:$0xff] }
  0xda   : > { %v890_v20 = vand.u32 4294901760, %v889_v29  ;;  %v7272_v29 = vand.u32 4294901760, %v6024_v40  ;;  %v7276_v40 = vld [vmem:[#allocation15_spill] sm:$0xff] }
  0xdc   : > { %4780 = vmatmul.mubr.f32.gmra.mrb[28].mxu0 %v880_v1  ;;  %5092 = vmatmul.mubr.f32.gmra.mrb[28].mxu1 %v880_v1  ;;  %v6706_v1 = vpack.c.bf16 %v7272_v29, %v7271_v46  ;;  %v7288_v46 = vld [vmem:[#allocation39_spill] sm:$0xff]  ;;  %v7289_v29 = vld [vmem:[#allocation44_spill] sm:$0xff] }
  0xdd   : > { %4782 = vmatprep.mubr.f32.mxu0 %v890_v20  ;;  %5094 = vmatprep.mubr.f32.mxu1 %v890_v20  ;;  %v7283_v20 = vld [vmem:[#allocation32_spill] sm:$0xff] }
  0xe0   : > { %4783 = vmatmul.mubr.f32.gmra.mrb[30].mxu0 %v900_v30  ;;  %5095 = vmatmul.mubr.f32.gmra.mrb[30].mxu1 %v900_v30  ;;  %v7285_v30 = vld [vmem:[#allocation36_spill] sm:$0xff] }
  0xe1   : > { %4789 = vmatprep.mubr.f32.mxu0 %v6240_v16  ;;  %5101 = vmatprep.mubr.f32.mxu1 %v6240_v16 }
  0xe4   : > { %4790 = vmatmul.mubr.f32.vlgmr.msra.gmra.mrb[0].mxu0 %v6254_v43  ;;  %5102 = vmatmul.mubr.f32.vlgmr.msra.gmra.mrb[0].mxu1 %v6254_v43 }
  0xe5   : > { %5368 = vmatpush3.bf16.msra.mxu0 %v6228_v53  ;;  %5392 = vmatpush3.bf16.msra.mxu1 %v6232_v54  ;;  %v7269_v53 = vand.u32 4294901760, %v6003_v32  ;;  %v7270_v54 = vand.u32 4294901760, %v6005_v33  ;;  %v7273_v32 = vld [vmem:[#allocation6_spill] sm:$0xff]  ;;  %v7274_v33 = vld [vmem:[#allocation12_spill] sm:$0xff] }
  0xe6   : > { %4792 = vmatprep.mubr.f32.mxu0 %v6237_v2  ;;  %5104 = vmatprep.mubr.f32.mxu1 %v6237_v2 }
  0xe7   : > { %5370 = vmatprep.subr.msk.bf16.mxu0 %vm6074_vm4, %v7268_v8  ;;  %5394 = vmatprep.subr.msk.bf16.mxu1 %vm6089_vm5, %v7268_v8  ;;  %v6700_v4 = vpack.c.bf16 %v7270_v54, %v7269_v53  ;;  %v7286_v53 = vld [vmem:[#allocation35_spill] sm:$0xff]  ;;  %v7287_v54 = vld [vmem:[#allocation40_spill] sm:$0xff] }
  0xe8   : > { %4793 = vmatmul.mubr.f32.gmra.mrb[2].mxu0 %v6251_v31  ;;  %5105 = vmatmul.mubr.f32.gmra.mrb[2].mxu1 %v6251_v31 }
  0xe9   : > { %4795 = vmatprep.mubr.f32.mxu0 %v6279_v23  ;;  %5107 = vmatprep.mubr.f32.mxu1 %v6279_v23 }
  0xec   : > { %4796 = vmatmul.mubr.f32.gmra.mrb[4].mxu0 %v6273_v13  ;;  %5108 = vmatmul.mubr.f32.gmra.mrb[4].mxu1 %v6273_v13 }
  0xed   : > { %4798 = vmatprep.mubr.f32.mxu0 %v6305_v21  ;;  %5110 = vmatprep.mubr.f32.mxu1 %v6305_v21 }
  0xf0   : > { %4799 = vmatmul.mubr.f32.gmra.mrb[6].mxu0 %v6299_v12  ;;  %5111 = vmatmul.mubr.f32.gmra.mrb[6].mxu1 %v6299_v12 }
  0xf1   : > { %4801 = vmatprep.mubr.f32.mxu0 %v6331_v59  ;;  %5113 = vmatprep.mubr.f32.mxu1 %v6331_v59 }
  0xf4   : > { %4802 = vmatmul.mubr.f32.gmra.mrb[8].mxu0 %v6321_v34  ;;  %5114 = vmatmul.mubr.f32.gmra.mrb[8].mxu1 %v6321_v34 }
  0xf5   : > { %4804 = vmatprep.mubr.f32.mxu0 %v6357_v22  ;;  %5116 = vmatprep.mubr.f32.mxu1 %v6357_v22 }
  0xf8   : > { %4805 = vmatmul.mubr.f32.gmra.mrb[10].mxu0 %v6351_v48  ;;  %5117 = vmatmul.mubr.f32.gmra.mrb[10].mxu1 %v6351_v48 }
  0xf9   : > { %4807 = vmatprep.mubr.f32.mxu0 %v6381_v62  ;;  %5119 = vmatprep.mubr.f32.mxu1 %v6381_v62 }
  0xfc   : > { %4808 = vmatmul.mubr.f32.gmra.mrb[12].mxu0 %v6373_v61  ;;  %5120 = vmatmul.mubr.f32.gmra.mrb[12].mxu1 %v6373_v61 }
  0xfd   : > { %4810 = vmatprep.mubr.f32.mxu0 %v6405_v58  ;;  %5122 = vmatprep.mubr.f32.mxu1 %v6405_v58 }
 0x100   : > { %4811 = vmatmul.mubr.f32.gmra.mrb[14].mxu0 %v6399_v55  ;;  %5123 = vmatmul.mubr.f32.gmra.mrb[14].mxu1 %v6399_v55 }
 0x101   : > { %4813 = vmatprep.mubr.f32.mxu0 %v6429_v44  ;;  %5125 = vmatprep.mubr.f32.mxu1 %v6429_v44 }
 0x104   : > { %4814 = vmatmul.mubr.f32.gmra.mrb[16].mxu0 %v6421_v18  ;;  %5126 = vmatmul.mubr.f32.gmra.mrb[16].mxu1 %v6421_v18 }
 0x105   : > { %4816 = vmatprep.mubr.f32.mxu0 %v6453_v10  ;;  %5128 = vmatprep.mubr.f32.mxu1 %v6453_v10 }
 0x108   : > { %4817 = vmatmul.mubr.f32.gmra.mrb[18].mxu0 %v6447_v24  ;;  %5129 = vmatmul.mubr.f32.gmra.mrb[18].mxu1 %v6447_v24 }
 0x109   : > { %4819 = vmatprep.mubr.f32.mxu0 %v6477_v5  ;;  %5131 = vmatprep.mubr.f32.mxu1 %v6477_v5 }
 0x10c   : > { %4820 = vmatmul.mubr.f32.gmra.mrb[20].mxu0 %v6469_v35  ;;  %5132 = vmatmul.mubr.f32.gmra.mrb[20].mxu1 %v6469_v35 }
 0x10d   : > { %4822 = vmatprep.mubr.f32.mxu0 %v6501_v26  ;;  %5134 = vmatprep.mubr.f32.mxu1 %v6501_v26 }
 0x110   : > { %4823 = vmatmul.mubr.f32.gmra.mrb[22].mxu0 %v6495_v41  ;;  %5135 = vmatmul.mubr.f32.gmra.mrb[22].mxu1 %v6495_v41 }
 0x111   : > { %4825 = vmatprep.mubr.f32.mxu0 %v6525_v27  ;;  %5137 = vmatprep.mubr.f32.mxu1 %v6525_v27 }
 0x114   : > { %4826 = vmatmul.mubr.f32.gmra.mrb[24].mxu0 %v6517_v56  ;;  %5138 = vmatmul.mubr.f32.gmra.mrb[24].mxu1 %v6517_v56 }
 0x115   : > { %4828 = vmatprep.mubr.f32.mxu0 %v6549_v49  ;;  %5140 = vmatprep.mubr.f32.mxu1 %v6549_v49 }
 0x118   : > { %4829 = vmatmul.mubr.f32.gmra.mrb[26].mxu0 %v6543_v19  ;;  %5141 = vmatmul.mubr.f32.gmra.mrb[26].mxu1 %v6543_v19 }
 0x119   : > { %4831 = vmatprep.mubr.f32.mxu0 %v6573_v50  ;;  %5143 = vmatprep.mubr.f32.mxu1 %v6573_v50 }
 0x11c   : > { %4832 = vmatmul.mubr.f32.gmra.mrb[28].mxu0 %v6565_v17  ;;  %5144 = vmatmul.mubr.f32.gmra.mrb[28].mxu1 %v6565_v17 }
 0x11d   : > { %4834 = vmatprep.mubr.f32.mxu0 %v6594_v37  ;;  %5146 = vmatprep.mubr.f32.mxu1 %v6594_v37 }
 0x120   : > { %4835 = vmatmul.mubr.f32.gmra.mrb[30].mxu0 %v6589_v38  ;;  %5147 = vmatmul.mubr.f32.gmra.mrb[30].mxu1 %v6589_v38 }
 0x121   : > { %4841 = vmatprep.mubr.f32.mxu0 %v6248_v28  ;;  %5153 = vmatprep.mubr.f32.mxu1 %v6248_v28  ;;  %v7279_v28 = vld [vmem:[#allocation24_spill] sm:$0xff] }
 0x124   : > { %4842 = vmatmul.mubr.f32.vlgmr.msra.gmra.mrb[0].mxu0 %v6268_v63  ;;  %5154 = vmatmul.mubr.f32.vlgmr.msra.gmra.mrb[0].mxu1 %v6268_v63  ;;  %v7280_v63 = vld [vmem:[#allocation23_spill] sm:$0xff] }
 0x125   : > { %5372 = vmatpush3.bf16.msk.msra.mxu0 %vm6074_vm4, %v7268_v8  ;;  %5396 = vmatpush3.bf16.msk.msra.mxu1 %vm6089_vm5, %v7268_v8 }
 0x126   : > { %4844 = vmatprep.mubr.f32.mxu0 %v6244_v25  ;;  %5156 = vmatprep.mubr.f32.mxu1 %v6244_v25  ;;  %v7278_v25 = vld [vmem:[#allocation19_spill] sm:$0xff] }
 0x127   : > { %5374 = vmatprep.subr.bf16.mxu0 %v6700_v4  ;;  %5398 = vmatprep.subr.bf16.mxu1 %v6706_v1 }
 0x128   : > { %4845 = vmatmul.mubr.f32.gmra.mrb[2].mxu0 %v7273_v32  ;;  %5157 = vmatmul.mubr.f32.gmra.mrb[2].mxu1 %v7273_v32  ;;  %v7290_v32 = vld [vmem:[#allocation43_spill] sm:$0xff] }
 0x129   : > { %4847 = vmatprep.mubr.f32.mxu0 %v6292_v45  ;;  %5159 = vmatprep.mubr.f32.mxu1 %v6292_v45  ;;  %v7277_v45 = vld [vmem:[#allocation20_spill] sm:$0xff] }
 0x12c   : > { %4848 = vmatmul.mubr.f32.gmra.mrb[4].mxu0 %v6286_v14  ;;  %5160 = vmatmul.mubr.f32.gmra.mrb[4].mxu1 %v6286_v14  ;;  %v7281_v14 = vld [vmem:[#allocation28_spill] sm:$0xff] }
 0x12d   : > { %4850 = vmatprep.mubr.f32.mxu0 %v6316_v47  ;;  %5162 = vmatprep.mubr.f32.mxu1 %v6316_v47  ;;  %v7282_v47 = vld [vmem:[#allocation27_spill] sm:$0xff] }
 0x130   : > { %4851 = vmatmul.mubr.f32.gmra.mrb[6].mxu0 %v7274_v33  ;;  %5163 = vmatmul.mubr.f32.gmra.mrb[6].mxu1 %v7274_v33  ;;  %v7291_v33 = vld [vmem:[#allocation47_spill] sm:$0xff] }
 0x131   : > { %4853 = vmatprep.mubr.f32.mxu0 %v7275_v36  ;;  %5165 = vmatprep.mubr.f32.mxu1 %v7275_v36  ;;  %v7292_v36 = vld [vmem:[#allocation50_spill] sm:$0xff] }
 0x134   : > { %4854 = vmatmul.mubr.f32.gmra.mrb[8].mxu0 %v7276_v40  ;;  %5166 = vmatmul.mubr.f32.gmra.mrb[8].mxu1 %v7276_v40  ;;  %v7301_v40 = vld [vmem:[#allocation18_spill] sm:$0xff] }
 0x135   : > { %4856 = vmatprep.mubr.f32.mxu0 %v7277_v45  ;;  %5168 = vmatprep.mubr.f32.mxu1 %v7277_v45  ;;  %v7302_v45 = vld [vmem:[#allocation17_spill] sm:$0xff] }
 0x138   : > { %4857 = vmatmul.mubr.f32.gmra.mrb[10].mxu0 %v7278_v25  ;;  %5169 = vmatmul.mubr.f32.gmra.mrb[10].mxu1 %v7278_v25  ;;  %v7303_v25 = vld [vmem:[#allocation22_spill] sm:$0xff] }
 0x139   : > { %4859 = vmatprep.mubr.f32.mxu0 %v7279_v28  ;;  %5171 = vmatprep.mubr.f32.mxu1 %v7279_v28  ;;  %v7304_v28 = vld [vmem:[#allocation21_spill] sm:$0xff] }
 0x13c   : > { %4860 = vmatmul.mubr.f32.gmra.mrb[12].mxu0 %v7280_v63  ;;  %5172 = vmatmul.mubr.f32.gmra.mrb[12].mxu1 %v7280_v63  ;;  %v7305_v63 = vld [vmem:[#allocation26_spill] sm:$0xff] }
 0x13d   : > { %4862 = vmatprep.mubr.f32.mxu0 %v7281_v14  ;;  %5174 = vmatprep.mubr.f32.mxu1 %v7281_v14  ;;  %v7306_v14 = vld [vmem:[#allocation25_spill] sm:$0xff] }
 0x140   : > { %4863 = vmatmul.mubr.f32.gmra.mrb[14].mxu0 %v7282_v47  ;;  %5175 = vmatmul.mubr.f32.gmra.mrb[14].mxu1 %v7282_v47  ;;  %v7307_v47 = vld [vmem:[#allocation30_spill] sm:$0xff] }
 0x141   : > { %4865 = vmatprep.mubr.f32.mxu0 %v7283_v20  ;;  %5177 = vmatprep.mubr.f32.mxu1 %v7283_v20  ;;  %v7308_v20 = vld [vmem:[#allocation29_spill] sm:$0xff] }
 0x144   : > { %4866 = vmatmul.mubr.f32.gmra.mrb[16].mxu0 %v7284_v52  ;;  %5178 = vmatmul.mubr.f32.gmra.mrb[16].mxu1 %v7284_v52  ;;  %v7309_v52 = vld [vmem:[#allocation34_spill] sm:$0xff] }
 0x145   : > { %4868 = vmatprep.mubr.f32.mxu0 %v7285_v30  ;;  %5180 = vmatprep.mubr.f32.mxu1 %v7285_v30  ;;  %v7310_v30 = vld [vmem:[#allocation33_spill] sm:$0xff] }
 0x148   : > { %4869 = vmatmul.mubr.f32.gmra.mrb[18].mxu0 %v7286_v53  ;;  %5181 = vmatmul.mubr.f32.gmra.mrb[18].mxu1 %v7286_v53  ;;  %v7311_v53 = vld [vmem:[#allocation38_spill] sm:$0xff] }
 0x149   : > { %4871 = vmatprep.mubr.f32.mxu0 %v7287_v54  ;;  %5183 = vmatprep.mubr.f32.mxu1 %v7287_v54  ;;  %v7312_v54 = vld [vmem:[#allocation37_spill] sm:$0xff] }
 0x14c   : > { %4872 = vmatmul.mubr.f32.gmra.mrb[20].mxu0 %v7288_v46  ;;  %5184 = vmatmul.mubr.f32.gmra.mrb[20].mxu1 %v7288_v46  ;;  %v7313_v46 = vld [vmem:[#allocation42_spill] sm:$0xff] }
 0x14d   : > { %4874 = vmatprep.mubr.f32.mxu0 %v7289_v29  ;;  %5186 = vmatprep.mubr.f32.mxu1 %v7289_v29  ;;  %v7314_v29 = vld [vmem:[#allocation41_spill] sm:$0xff] }
 0x150   : > { %4875 = vmatmul.mubr.f32.gmra.mrb[22].mxu0 %v7290_v32  ;;  %5187 = vmatmul.mubr.f32.gmra.mrb[22].mxu1 %v7290_v32  ;;  %v7315_v32 = vld [vmem:[#allocation46_spill] sm:$0xff] }
 0x151   : > { %4877 = vmatprep.mubr.f32.mxu0 %v7291_v33  ;;  %5189 = vmatprep.mubr.f32.mxu1 %v7291_v33  ;;  %v7316_v33 = vld [vmem:[#allocation45_spill] sm:$0xff] }
 0x154   : > { %4878 = vmatmul.mubr.f32.gmra.mrb[24].mxu0 %v6532_v11  ;;  %5190 = vmatmul.mubr.f32.gmra.mrb[24].mxu1 %v6532_v11  ;;  %v7293_v11 = vld [vmem:[#allocation5_spill] sm:$0xff] }
 0x155   : > { %4880 = vmatprep.mubr.f32.mxu0 %v6560_v42  ;;  %5192 = vmatprep.mubr.f32.mxu1 %v6560_v42  ;;  %v7294_v42 = vld [vmem:[#allocation9_spill] sm:$0xff] }
 0x158   : > { %4881 = vmatmul.mubr.f32.gmra.mrb[26].mxu0 %v7292_v36  ;;  %5193 = vmatmul.mubr.f32.gmra.mrb[26].mxu1 %v7292_v36  ;;  %v7317_v36 = vld [vmem:[#allocation49_spill] sm:$0xff] }
 0x159   : > { %4883 = vmatprep.mubr.f32.mxu0 %v6584_v39  ;;  %5195 = vmatprep.mubr.f32.mxu1 %v6584_v39  ;;  %v7295_v39 = vld [vmem:[#allocation7_spill] sm:$0xff] }
 0x15c   : > { %4884 = vmatmul.mubr.f32.gmra.mrb[28].mxu0 %v6580_v15  ;;  %5196 = vmatmul.mubr.f32.gmra.mrb[28].mxu1 %v6580_v15  ;;  %v7297_v15 = vld [vmem:[#allocation11_spill] sm:$0xff] }
 0x15d   : > { %4886 = vmatprep.mubr.f32.mxu0 %v6606_v60  ;;  %5198 = vmatprep.mubr.f32.mxu1 %v6606_v60  ;;  %v7298_v60 = vld [vmem:[#allocation10_spill] sm:$0xff] }
 0x160   : > { %4887 = vmatmul.mubr.f32.gmra.mrb[30].mxu0 %v6603_v51  ;;  %5199 = vmatmul.mubr.f32.gmra.mrb[30].mxu1 %v6603_v51  ;;  %v7296_v51 = vld [vmem:[#allocation8_spill] sm:$0xff] }
 0x161   : > { %4893 = vmatprep.mubr.f32.mxu0 %v7293_v11  ;;  %5205 = vmatprep.mubr.f32.mxu1 %v7293_v11  ;;  %v7318_v11 = vld [vmem:[#allocation48_spill] sm:$0xff] }
 0x164   : > { %4894 = vmatmul.mubr.f32.vlgmr.msra.gmra.mrb[0].mxu0 %v7294_v42  ;;  %5206 = vmatmul.mubr.f32.vlgmr.msra.gmra.mrb[0].mxu1 %v7294_v42  ;;  %v7319_v42 = vld [vmem:[#allocation52_spill] sm:$0xff] }
 0x165   : > { %5376 = vmatpush3.bf16.msra.mxu0 %v6700_v4  ;;  %5400 = vmatpush3.bf16.msra.mxu1 %v6706_v1  ;;  %v7299_v4 = vld [vmem:[#allocation14_spill] sm:$0xff]  ;;  %v7300_v1 = vld [vmem:[#allocation13_spill] sm:$0xff] }
 0x166   : > { %4896 = vmatprep.mubr.f32.mxu0 %v7295_v39  ;;  %5208 = vmatprep.mubr.f32.mxu1 %v7295_v39  ;;  %v7320_v39 = vld [vmem:[#allocation51_spill] sm:$0xff] }
 0x167   : > { %5378 = vmatprep.subr.msk.bf16.mxu0 %vm6074_vm4, %v7268_v8  ;;  %5402 = vmatprep.subr.msk.bf16.mxu1 %vm6089_vm5, %v7268_v8 }
 0x168   : > { %4897 = vmatmul.mubr.f32.gmra.mrb[2].mxu0 %v7296_v51  ;;  %5209 = vmatmul.mubr.f32.gmra.mrb[2].mxu1 %v7296_v51 }
 0x169   : > { %4899 = vmatprep.mubr.f32.mxu0 %v7297_v15  ;;  %5211 = vmatprep.mubr.f32.mxu1 %v7297_v15 }
 0x16c   : > { %4900 = vmatmul.mubr.f32.gmra.mrb[4].mxu0 %v7298_v60  ;;  %5212 = vmatmul.mubr.f32.gmra.mrb[4].mxu1 %v7298_v60 }
 0x16d   : > { %4902 = vmatprep.mubr.f32.mxu0 %v7299_v4  ;;  %5214 = vmatprep.mubr.f32.mxu1 %v7299_v4 }
 0x170   : > { %4903 = vmatmul.mubr.f32.gmra.mrb[6].mxu0 %v7300_v1  ;;  %5215 = vmatmul.mubr.f32.gmra.mrb[6].mxu1 %v7300_v1 }
 0x171   : > { %4905 = vmatprep.mubr.f32.mxu0 %v7301_v40  ;;  %5217 = vmatprep.mubr.f32.mxu1 %v7301_v40 }
 0x174   : > { %4906 = vmatmul.mubr.f32.gmra.mrb[8].mxu0 %v7302_v45  ;;  %5218 = vmatmul.mubr.f32.gmra.mrb[8].mxu1 %v7302_v45 }
 0x175   : > { %4908 = vmatprep.mubr.f32.mxu0 %v7303_v25  ;;  %5220 = vmatprep.mubr.f32.mxu1 %v7303_v25 }
 0x178   : > { %4909 = vmatmul.mubr.f32.gmra.mrb[10].mxu0 %v7304_v28  ;;  %5221 = vmatmul.mubr.f32.gmra.mrb[10].mxu1 %v7304_v28 }
 0x179   : > { %4911 = vmatprep.mubr.f32.mxu0 %v7305_v63  ;;  %5223 = vmatprep.mubr.f32.mxu1 %v7305_v63 }
 0x17c   : > { %4912 = vmatmul.mubr.f32.gmra.mrb[12].mxu0 %v7306_v14  ;;  %5224 = vmatmul.mubr.f32.gmra.mrb[12].mxu1 %v7306_v14 }
 0x17d   : > { %4914 = vmatprep.mubr.f32.mxu0 %v7307_v47  ;;  %5226 = vmatprep.mubr.f32.mxu1 %v7307_v47 }
 0x180   : > { %4915 = vmatmul.mubr.f32.gmra.mrb[14].mxu0 %v7308_v20  ;;  %5227 = vmatmul.mubr.f32.gmra.mrb[14].mxu1 %v7308_v20 }
 0x181   : > { %4917 = vmatprep.mubr.f32.mxu0 %v7309_v52  ;;  %5229 = vmatprep.mubr.f32.mxu1 %v7309_v52 }
 0x184   : > { %4918 = vmatmul.mubr.f32.gmra.mrb[16].mxu0 %v7310_v30  ;;  %5230 = vmatmul.mubr.f32.gmra.mrb[16].mxu1 %v7310_v30 }
 0x185   : > { %4920 = vmatprep.mubr.f32.mxu0 %v7311_v53  ;;  %5232 = vmatprep.mubr.f32.mxu1 %v7311_v53 }
 0x188   : > { %4921 = vmatmul.mubr.f32.gmra.mrb[18].mxu0 %v7312_v54  ;;  %5233 = vmatmul.mubr.f32.gmra.mrb[18].mxu1 %v7312_v54 }
 0x189   : > { %4923 = vmatprep.mubr.f32.mxu0 %v7313_v46  ;;  %5235 = vmatprep.mubr.f32.mxu1 %v7313_v46 }
 0x18c   : > { %4924 = vmatmul.mubr.f32.gmra.mrb[20].mxu0 %v7314_v29  ;;  %5236 = vmatmul.mubr.f32.gmra.mrb[20].mxu1 %v7314_v29 }
 0x18d   : > { %4926 = vmatprep.mubr.f32.mxu0 %v7315_v32  ;;  %5238 = vmatprep.mubr.f32.mxu1 %v7315_v32 }
 0x190   : > { %4927 = vmatmul.mubr.f32.gmra.mrb[22].mxu0 %v7316_v33  ;;  %5239 = vmatmul.mubr.f32.gmra.mrb[22].mxu1 %v7316_v33 }
 0x191   : > { %4929 = vmatprep.mubr.f32.mxu0 %v7317_v36  ;;  %5241 = vmatprep.mubr.f32.mxu1 %v7317_v36 }
 0x194   : > { %4930 = vmatmul.mubr.f32.gmra.mrb[24].mxu0 %v7318_v11  ;;  %5242 = vmatmul.mubr.f32.gmra.mrb[24].mxu1 %v7318_v11 }
 0x195   : > { %4932 = vmatprep.mubr.f32.mxu0 %v7319_v42  ;;  %5244 = vmatprep.mubr.f32.mxu1 %v7319_v42 }
 0x198   : > { %4933 = vmatmul.mubr.f32.gmra.mrb[26].mxu0 %v7320_v39  ;;  %5245 = vmatmul.mubr.f32.gmra.mrb[26].mxu1 %v7320_v39 }
 0x199   : > { %4935 = vmatprep.mubr.f32.mxu0 %v6597_v0  ;;  %5247 = vmatprep.mubr.f32.mxu1 %v6597_v0 }
 0x19c   : > { %4936 = vmatmul.mubr.f32.gmra.mrb[28].mxu0 %v6600_v9  ;;  %5248 = vmatmul.mubr.f32.gmra.mrb[28].mxu1 %v6600_v9 }
 0x19d   : > { %4938 = vmatprep.mubr.f32.mxu0 %v6613_v7  ;;  %5250 = vmatprep.mubr.f32.mxu1 %v6613_v7 }
 0x1a0   : > { %4939 = vmatmul.mubr.f32.gmra.mrb[30].mxu0 %v6616_v57  ;;  %5251 = vmatmul.mubr.f32.gmra.mrb[30].mxu1 %v6616_v57 }
 0x1a1   : > { %4945 = vmatprep.mubr.f32.mxu0 %v6240_v16  ;;  %5257 = vmatprep.mubr.f32.mxu1 %v6240_v16 }
 0x1a4   : > { %4946 = vmatmul.mubr.f32.vlgmr.msra.gmra.mrb[0].mxu0 %v6254_v43  ;;  %5258 = vmatmul.mubr.f32.vlgmr.msra.gmra.mrb[0].mxu1 %v6254_v43 }
 0x1a5   : > { %5380 = vmatpush3.bf16.msk.msra.mxu0 %vm6074_vm4, %v7268_v8  ;;  %5404 = vmatpush3.bf16.msk.msra.mxu1 %vm6089_vm5, %v7268_v8 }
 0x1a6   : > { %4948 = vmatprep.mubr.f32.mxu0 %v6237_v2  ;;  %5260 = vmatprep.mubr.f32.mxu1 %v6237_v2 }
 0x1a8   : > { %4949 = vmatmul.mubr.f32.gmra.mrb[2].mxu0 %v6251_v31  ;;  %5261 = vmatmul.mubr.f32.gmra.mrb[2].mxu1 %v6251_v31 }
 0x1a9   : > { %4951 = vmatprep.mubr.f32.mxu0 %v6279_v23  ;;  %5263 = vmatprep.mubr.f32.mxu1 %v6279_v23 }
 0x1ac   : > { %4952 = vmatmul.mubr.f32.gmra.mrb[4].mxu0 %v6273_v13  ;;  %5264 = vmatmul.mubr.f32.gmra.mrb[4].mxu1 %v6273_v13 }
 0x1ad   : > { %4954 = vmatprep.mubr.f32.mxu0 %v6305_v21  ;;  %5266 = vmatprep.mubr.f32.mxu1 %v6305_v21 }
 0x1b0   : > { %4955 = vmatmul.mubr.f32.gmra.mrb[6].mxu0 %v6299_v12  ;;  %5267 = vmatmul.mubr.f32.gmra.mrb[6].mxu1 %v6299_v12 }
 0x1b1   : > { %4957 = vmatprep.mubr.f32.mxu0 %v6331_v59  ;;  %5269 = vmatprep.mubr.f32.mxu1 %v6331_v59 }
 0x1b4   : > { %4958 = vmatmul.mubr.f32.gmra.mrb[8].mxu0 %v6321_v34  ;;  %5270 = vmatmul.mubr.f32.gmra.mrb[8].mxu1 %v6321_v34 }
 0x1b5   : > { %4960 = vmatprep.mubr.f32.mxu0 %v6357_v22  ;;  %5272 = vmatprep.mubr.f32.mxu1 %v6357_v22 }
 0x1b8   : > { %4961 = vmatmul.mubr.f32.gmra.mrb[10].mxu0 %v6351_v48  ;;  %5273 = vmatmul.mubr.f32.gmra.mrb[10].mxu1 %v6351_v48 }
 0x1b9   : > { %4963 = vmatprep.mubr.f32.mxu0 %v6381_v62  ;;  %5275 = vmatprep.mubr.f32.mxu1 %v6381_v62 }
 0x1bc   : > { %4964 = vmatmul.mubr.f32.gmra.mrb[12].mxu0 %v6373_v61  ;;  %5276 = vmatmul.mubr.f32.gmra.mrb[12].mxu1 %v6373_v61 }
 0x1bd   : > { %4966 = vmatprep.mubr.f32.mxu0 %v6405_v58  ;;  %5278 = vmatprep.mubr.f32.mxu1 %v6405_v58 }
 0x1c0   : > { %4967 = vmatmul.mubr.f32.gmra.mrb[14].mxu0 %v6399_v55  ;;  %5279 = vmatmul.mubr.f32.gmra.mrb[14].mxu1 %v6399_v55 }
 0x1c1   : > { %4969 = vmatprep.mubr.f32.mxu0 %v6429_v44  ;;  %5281 = vmatprep.mubr.f32.mxu1 %v6429_v44 }
 0x1c4   : > { %4970 = vmatmul.mubr.f32.gmra.mrb[16].mxu0 %v6421_v18  ;;  %5282 = vmatmul.mubr.f32.gmra.mrb[16].mxu1 %v6421_v18 }
 0x1c5   : > { %4972 = vmatprep.mubr.f32.mxu0 %v6453_v10  ;;  %5284 = vmatprep.mubr.f32.mxu1 %v6453_v10 }
 0x1c8   : > { %4973 = vmatmul.mubr.f32.gmra.mrb[18].mxu0 %v6447_v24  ;;  %5285 = vmatmul.mubr.f32.gmra.mrb[18].mxu1 %v6447_v24 }
 0x1c9   : > { %4975 = vmatprep.mubr.f32.mxu0 %v6477_v5  ;;  %5287 = vmatprep.mubr.f32.mxu1 %v6477_v5 }
 0x1cc   : > { %4976 = vmatmul.mubr.f32.gmra.mrb[20].mxu0 %v6469_v35  ;;  %5288 = vmatmul.mubr.f32.gmra.mrb[20].mxu1 %v6469_v35 }
 0x1cd   : > { %4978 = vmatprep.mubr.f32.mxu0 %v6501_v26  ;;  %5290 = vmatprep.mubr.f32.mxu1 %v6501_v26 }
 0x1d0   : > { %4979 = vmatmul.mubr.f32.gmra.mrb[22].mxu0 %v6495_v41  ;;  %5291 = vmatmul.mubr.f32.gmra.mrb[22].mxu1 %v6495_v41 }
 0x1d1   : > { %4981 = vmatprep.mubr.f32.mxu0 %v6525_v27  ;;  %5293 = vmatprep.mubr.f32.mxu1 %v6525_v27 }
 0x1d4   : > { %4982 = vmatmul.mubr.f32.gmra.mrb[24].mxu0 %v6517_v56  ;;  %5294 = vmatmul.mubr.f32.gmra.mrb[24].mxu1 %v6517_v56 }
 0x1d5   : > { %4984 = vmatprep.mubr.f32.mxu0 %v6549_v49  ;;  %5296 = vmatprep.mubr.f32.mxu1 %v6549_v49 }
 0x1d8   : > { %4985 = vmatmul.mubr.f32.gmra.mrb[26].mxu0 %v6543_v19  ;;  %5297 = vmatmul.mubr.f32.gmra.mrb[26].mxu1 %v6543_v19 }
 0x1d9   : > { %4987 = vmatprep.mubr.f32.mxu0 %v6573_v50  ;;  %5299 = vmatprep.mubr.f32.mxu1 %v6573_v50 }
 0x1dc   : > { %4988 = vmatmul.mubr.f32.gmra.mrb[28].mxu0 %v6565_v17  ;;  %5300 = vmatmul.mubr.f32.gmra.mrb[28].mxu1 %v6565_v17 }
 0x1dd   : > { %4990 = vmatprep.mubr.f32.mxu0 %v6594_v37  ;;  %5302 = vmatprep.mubr.f32.mxu1 %v6594_v37 }
 0x1e0   : > { %4991 = vmatmul.mubr.f32.gmra.mrb[30].mxu0 %v6589_v38  ;;  %5303 = vmatmul.mubr.f32.gmra.mrb[30].mxu1 %v6589_v38 }
 0x1e1   : > { %4997 = vmatprep.mubr.f32.mxu0 %v6240_v16  ;;  %5309 = vmatprep.mubr.f32.mxu1 %v6240_v16 }
 0x1e4   : > { %4998 = vmatmul.mubr.f32.vlgmr.msra.gmra.mrb[0].mxu0 %v6254_v43  ;;  %5310 = vmatmul.mubr.f32.vlgmr.msra.gmra.mrb[0].mxu1 %v6254_v43 }
 0x1e5   : > { %5000 = vmatprep.mubr.f32.mxu0 %v6237_v2  ;;  %5312 = vmatprep.mubr.f32.mxu1 %v6237_v2 }
 0x1e8   : > { %5001 = vmatmul.mubr.f32.gmra.mrb[2].mxu0 %v6251_v31  ;;  %5313 = vmatmul.mubr.f32.gmra.mrb[2].mxu1 %v6251_v31 }
 0x1e9   : > { %5003 = vmatprep.mubr.f32.mxu0 %v6279_v23  ;;  %5315 = vmatprep.mubr.f32.mxu1 %v6279_v23 }
 0x1ec   : > { %5004 = vmatmul.mubr.f32.gmra.mrb[4].mxu0 %v6273_v13  ;;  %5316 = vmatmul.mubr.f32.gmra.mrb[4].mxu1 %v6273_v13 }
 0x1ed   : > { %5006 = vmatprep.mubr.f32.mxu0 %v6305_v21  ;;  %5318 = vmatprep.mubr.f32.mxu1 %v6305_v21 }
 0x1f0   : > { %5007 = vmatmul.mubr.f32.gmra.mrb[6].mxu0 %v6299_v12  ;;  %5319 = vmatmul.mubr.f32.gmra.mrb[6].mxu1 %v6299_v12 }
 0x1f1   : > { %5009 = vmatprep.mubr.f32.mxu0 %v6331_v59  ;;  %5321 = vmatprep.mubr.f32.mxu1 %v6331_v59 }
 0x1f4   : > { %5010 = vmatmul.mubr.f32.gmra.mrb[8].mxu0 %v6321_v34  ;;  %5322 = vmatmul.mubr.f32.gmra.mrb[8].mxu1 %v6321_v34 }
 0x1f5   : > { %5012 = vmatprep.mubr.f32.mxu0 %v6357_v22  ;;  %5324 = vmatprep.mubr.f32.mxu1 %v6357_v22 }
 0x1f8   : > { %5013 = vmatmul.mubr.f32.gmra.mrb[10].mxu0 %v6351_v48  ;;  %5325 = vmatmul.mubr.f32.gmra.mrb[10].mxu1 %v6351_v48 }
 0x1f9   : > { %5015 = vmatprep.mubr.f32.mxu0 %v6381_v62  ;;  %5327 = vmatprep.mubr.f32.mxu1 %v6381_v62 }
 0x1fc   : > { %5016 = vmatmul.mubr.f32.gmra.mrb[12].mxu0 %v6373_v61  ;;  %5328 = vmatmul.mubr.f32.gmra.mrb[12].mxu1 %v6373_v61 }
 0x1fd   : > { %5018 = vmatprep.mubr.f32.mxu0 %v6405_v58  ;;  %5330 = vmatprep.mubr.f32.mxu1 %v6405_v58 }
 0x200   : > { %5019 = vmatmul.mubr.f32.gmra.mrb[14].mxu0 %v6399_v55  ;;  %5331 = vmatmul.mubr.f32.gmra.mrb[14].mxu1 %v6399_v55 }
 0x201   : > { %5021 = vmatprep.mubr.f32.mxu0 %v6429_v44  ;;  %5333 = vmatprep.mubr.f32.mxu1 %v6429_v44 }
 0x204   : > { %5022 = vmatmul.mubr.f32.gmra.mrb[16].mxu0 %v6421_v18  ;;  %5334 = vmatmul.mubr.f32.gmra.mrb[16].mxu1 %v6421_v18 }
 0x205   : > { %5024 = vmatprep.mubr.f32.mxu0 %v6453_v10  ;;  %5336 = vmatprep.mubr.f32.mxu1 %v6453_v10 }
 0x208   : > { %5025 = vmatmul.mubr.f32.gmra.mrb[18].mxu0 %v6447_v24  ;;  %5337 = vmatmul.mubr.f32.gmra.mrb[18].mxu1 %v6447_v24 }
 0x209   : > { %5027 = vmatprep.mubr.f32.mxu0 %v6477_v5  ;;  %5339 = vmatprep.mubr.f32.mxu1 %v6477_v5 }
 0x20c   : > { %5028 = vmatmul.mubr.f32.gmra.mrb[20].mxu0 %v6469_v35  ;;  %5340 = vmatmul.mubr.f32.gmra.mrb[20].mxu1 %v6469_v35 }
 0x20d   : > { %5030 = vmatprep.mubr.f32.mxu0 %v6501_v26  ;;  %5342 = vmatprep.mubr.f32.mxu1 %v6501_v26 }
 0x210   : > { %5031 = vmatmul.mubr.f32.gmra.mrb[22].mxu0 %v6495_v41  ;;  %5343 = vmatmul.mubr.f32.gmra.mrb[22].mxu1 %v6495_v41 }
 0x211   : > { %5033 = vmatprep.mubr.f32.mxu0 %v6525_v27  ;;  %5345 = vmatprep.mubr.f32.mxu1 %v6525_v27 }
 0x214   : > { %5034 = vmatmul.mubr.f32.gmra.mrb[24].mxu0 %v6517_v56  ;;  %5346 = vmatmul.mubr.f32.gmra.mrb[24].mxu1 %v6517_v56 }
 0x215   : > { %5036 = vmatprep.mubr.f32.mxu0 %v6549_v49  ;;  %5348 = vmatprep.mubr.f32.mxu1 %v6549_v49 }
 0x218   : > { %5037 = vmatmul.mubr.f32.gmra.mrb[26].mxu0 %v6543_v19  ;;  %5349 = vmatmul.mubr.f32.gmra.mrb[26].mxu1 %v6543_v19 }
 0x219   : > { %5039 = vmatprep.mubr.f32.mxu0 %v6573_v50  ;;  %5351 = vmatprep.mubr.f32.mxu1 %v6573_v50 }
 0x21c   : > { %5040 = vmatmul.mubr.f32.gmra.mrb[28].mxu0 %v6565_v17  ;;  %5352 = vmatmul.mubr.f32.gmra.mrb[28].mxu1 %v6565_v17 }
 0x21d   : > { %5042 = vmatprep.mubr.f32.mxu0 %v6594_v37  ;;  %5354 = vmatprep.mubr.f32.mxu1 %v6594_v37 }
 0x220   : > { %5043 = vmatmul.mubr.f32.gmra.mrb[30].mxu0 %v6589_v38  ;;  %5355 = vmatmul.mubr.f32.gmra.mrb[30].mxu1 %v6589_v38 }
 0x2b7   : > { %v4999_v3 = vpop.f32.mrb[0].mxu0  ;;  %v5311_v6 = vpop.f32.mrb[0].mxu1 }
 0x2b8   : > { %v4104_v2 = vmax.f32 %v4999_v3, %v5311_v6  ;;  %v2121_v16 = vpop.f32.mrb[1].mxu0  ;;  %v3913_v31 = vpop.f32.mrb[1].mxu1 }
 0x2b9   : > { %v4103_v43 = vmax.f32 %v2121_v16, %v3913_v31 }
 0x2ba   : > { %4137 = vst.msk [vmem:[%s6987_s28 + $0x8] sm:$0xff] %vm4135_vm7, %v4104_v2 }
 0x2bb   : > { %4136 = vst.msk [vmem:[%s6987_s28] sm:$0xff] %vm4135_vm7, %v4103_v43  ;;  %v5002_v13 = vpop.f32.mrb[2].mxu0  ;;  %v5314_v23 = vpop.f32.mrb[2].mxu1 }
 0x2bc   : > { %v4106_v12 = vmax.f32 %v5002_v13, %v5314_v23  ;;  %v2133_v21 = vpop.f32.mrb[3].mxu0  ;;  %v3925_v34 = vpop.f32.mrb[3].mxu1 }
 0x2bd   : > { %v4105_v59 = vmax.f32 %v2133_v21, %v3925_v34 }
 0x2be   : > { %4139 = vst.msk [vmem:[%s6987_s28 + $0x18] sm:$0xff] %vm4135_vm7, %v4106_v12 }
 0x2bf   : > { %4138 = vst.msk [vmem:[%s6987_s28 + $0x10] sm:$0xff] %vm4135_vm7, %v4105_v59  ;;  %v5005_v48 = vpop.f32.mrb[4].mxu0  ;;  %v5317_v22 = vpop.f32.mrb[4].mxu1 }
 0x2c0   : > { %v4108_v61 = vmax.f32 %v5005_v48, %v5317_v22  ;;  %v2145_v62 = vpop.f32.mrb[5].mxu0  ;;  %v3937_v55 = vpop.f32.mrb[5].mxu1 }
 0x2c1   : > { %v4107_v58 = vmax.f32 %v2145_v62, %v3937_v55 }
 0x2c2   : > { %4141 = vst.msk [vmem:[%s6987_s28 + $0x28] sm:$0xff] %vm4135_vm7, %v4108_v61 }
 0x2c3   : > { %4140 = vst.msk [vmem:[%s6987_s28 + $0x20] sm:$0xff] %vm4135_vm7, %v4107_v58  ;;  %v5008_v18 = vpop.f32.mrb[6].mxu0  ;;  %v5320_v44 = vpop.f32.mrb[6].mxu1 }
 0x2c4   : > { %v4110_v24 = vmax.f32 %v5008_v18, %v5320_v44  ;;  %v2157_v10 = vpop.f32.mrb[7].mxu0  ;;  %v3949_v35 = vpop.f32.mrb[7].mxu1 }
 0x2c5   : > { %v4109_v5 = vmax.f32 %v2157_v10, %v3949_v35 }
 0x2c6   : > { %4143 = vst.msk [vmem:[%s6987_s28 + $0x38] sm:$0xff] %vm4135_vm7, %v4110_v24 }
 0x2c7   : > { %4142 = vst.msk [vmem:[%s6987_s28 + $0x30] sm:$0xff] %vm4135_vm7, %v4109_v5  ;;  %v5011_v41 = vpop.f32.mrb[8].mxu0  ;;  %v5323_v26 = vpop.f32.mrb[8].mxu1 }
 0x2c8   : > { %v4112_v56 = vmax.f32 %v5011_v41, %v5323_v26  ;;  %v2169_v7 = vpop.f32.mrb[9].mxu0  ;;  %v3961_v27 = vpop.f32.mrb[9].mxu1 }
 0x2c9   : > { %v4111_v19 = vmax.f32 %v2169_v7, %v3961_v27 }
 0x2ca   : > { %4145 = vst.msk [vmem:[%s6987_s28 + $0x48] sm:$0xff] %vm4135_vm7, %v4112_v56 }
 0x2cb   : > { %4144 = vst.msk [vmem:[%s6987_s28 + $0x40] sm:$0xff] %vm4135_vm7, %v4111_v19  ;;  %v5014_v49 = vpop.f32.mrb[10].mxu0  ;;  %v5326_v17 = vpop.f32.mrb[10].mxu1 }
 0x2cc   : > { %v4114_v50 = vmax.f32 %v5014_v49, %v5326_v17  ;;  %v2181_v38 = vpop.f32.mrb[11].mxu0  ;;  %v3973_v37 = vpop.f32.mrb[11].mxu1 }
 0x2cd   : > { %v4113_v0 = vmax.f32 %v2181_v38, %v3973_v37 }
 0x2ce   : > { %4147 = vst.msk [vmem:[%s6987_s28 + $0x58] sm:$0xff] %vm4135_vm7, %v4114_v50 }
 0x2cf   : > { %4146 = vst.msk [vmem:[%s6987_s28 + $0x50] sm:$0xff] %vm4135_vm7, %v4113_v0  ;;  %v5017_v9 = vpop.f32.mrb[12].mxu0  ;;  %v5329_v57 = vpop.f32.mrb[12].mxu1 }
 0x2d0   : > { %v4116_v8 = vmax.f32 %v5017_v9, %v5329_v57  ;;  %v2193_v51 = vpop.f32.mrb[13].mxu0  ;;  %v3985_v15 = vpop.f32.mrb[13].mxu1 }
 0x2d1   : > { %v4115_v60 = vmax.f32 %v2193_v51, %v3985_v15 }
 0x2d2   : > { %4149 = vst.msk [vmem:[%s6987_s28 + $0x68] sm:$0xff] %vm4135_vm7, %v4116_v8 }
 0x2d3   : > { %4148 = vst.msk [vmem:[%s6987_s28 + $0x60] sm:$0xff] %vm4135_vm7, %v4115_v60  ;;  %v5020_v4 = vpop.f32.mrb[14].mxu0  ;;  %v5332_v1 = vpop.f32.mrb[14].mxu1 }
 0x2d4   : > { %v4118_v40 = vmax.f32 %v5020_v4, %v5332_v1  ;;  %v2205_v45 = vpop.f32.mrb[15].mxu0  ;;  %v3997_v25 = vpop.f32.mrb[15].mxu1 }
 0x2d5   : > { %v4117_v28 = vmax.f32 %v2205_v45, %v3997_v25 }
 0x2d6   : > { %4151 = vst.msk [vmem:[%s6987_s28 + $0x78] sm:$0xff] %vm4135_vm7, %v4118_v40 }
 0x2d7   : > { %4150 = vst.msk [vmem:[%s6987_s28 + $0x70] sm:$0xff] %vm4135_vm7, %v4117_v28  ;;  %v5023_v63 = vpop.f32.mrb[16].mxu0  ;;  %v5335_v14 = vpop.f32.mrb[16].mxu1 }
 0x2d8   : > { %v4120_v47 = vmax.f32 %v5023_v63, %v5335_v14  ;;  %v2217_v20 = vpop.f32.mrb[17].mxu0  ;;  %v4009_v52 = vpop.f32.mrb[17].mxu1 }
 0x2d9   : > { %v4119_v30 = vmax.f32 %v2217_v20, %v4009_v52 }
 0x2da   : > { %4153 = vst.msk [vmem:[%s6987_s28 + $0x88] sm:$0xff] %vm4135_vm7, %v4120_v47 }
 0x2db   : > { %4152 = vst.msk [vmem:[%s6987_s28 + $0x80] sm:$0xff] %vm4135_vm7, %v4119_v30  ;;  %v5026_v53 = vpop.f32.mrb[18].mxu0  ;;  %v5338_v54 = vpop.f32.mrb[18].mxu1 }
 0x2dc   : > { %v4122_v46 = vmax.f32 %v5026_v53, %v5338_v54  ;;  %v2229_v29 = vpop.f32.mrb[19].mxu0  ;;  %v4021_v32 = vpop.f32.mrb[19].mxu1 }
 0x2dd   : > { %v4121_v33 = vmax.f32 %v2229_v29, %v4021_v32 }
 0x2de   : > { %4155 = vst.msk [vmem:[%s6987_s28 + $0x98] sm:$0xff] %vm4135_vm7, %v4122_v46 }
 0x2df   : > { %4154 = vst.msk [vmem:[%s6987_s28 + $0x90] sm:$0xff] %vm4135_vm7, %v4121_v33  ;;  %v5029_v36 = vpop.f32.mrb[20].mxu0  ;;  %v5341_v11 = vpop.f32.mrb[20].mxu1 }
 0x2e0   : > { %v4124_v42 = vmax.f32 %v5029_v36, %v5341_v11  ;;  %v2241_v39 = vpop.f32.mrb[21].mxu0  ;;  %v4033_v3 = vpop.f32.mrb[21].mxu1 }
 0x2e1   : > { %v4123_v6 = vmax.f32 %v2241_v39, %v4033_v3 }
 0x2e2   : > { %4157 = vst.msk [vmem:[%s6987_s28 + $0xa8] sm:$0xff] %vm4135_vm7, %v4124_v42 }
 0x2e3   : > { %4156 = vst.msk [vmem:[%s6987_s28 + $0xa0] sm:$0xff] %vm4135_vm7, %v4123_v6  ;;  %v5032_v2 = vpop.f32.mrb[22].mxu0  ;;  %v5344_v16 = vpop.f32.mrb[22].mxu1 }
 0x2e4   : > { %v4126_v31 = vmax.f32 %v5032_v2, %v5344_v16  ;;  %v2253_v43 = vpop.f32.mrb[23].mxu0  ;;  %v4045_v13 = vpop.f32.mrb[23].mxu1 }
 0x2e5   : > { %v4125_v23 = vmax.f32 %v2253_v43, %v4045_v13 }
 0x2e6   : > { %4159 = vst.msk [vmem:[%s6987_s28 + $0xb8] sm:$0xff] %vm4135_vm7, %v4126_v31 }
 0x2e7   : > { %4158 = vst.msk [vmem:[%s6987_s28 + $0xb0] sm:$0xff] %vm4135_vm7, %v4125_v23  ;;  %v5035_v12 = vpop.f32.mrb[24].mxu0  ;;  %v5347_v21 = vpop.f32.mrb[24].mxu1 }
 0x2e8   : > { %v4128_v34 = vmax.f32 %v5035_v12, %v5347_v21  ;;  %v2265_v59 = vpop.f32.mrb[25].mxu0  ;;  %v4057_v48 = vpop.f32.mrb[25].mxu1 }
 0x2e9   : > { %v4127_v22 = vmax.f32 %v2265_v59, %v4057_v48 }
 0x2ea   : > { %4161 = vst.msk [vmem:[%s6987_s28 + $0xc8] sm:$0xff] %vm4135_vm7, %v4128_v34 }
 0x2eb   : > { %4160 = vst.msk [vmem:[%s6987_s28 + $0xc0] sm:$0xff] %vm4135_vm7, %v4127_v22  ;;  %v5038_v61 = vpop.f32.mrb[26].mxu0  ;;  %v5350_v62 = vpop.f32.mrb[26].mxu1 }
 0x2ec   : > { %v4130_v55 = vmax.f32 %v5038_v61, %v5350_v62  ;;  %v2277_v58 = vpop.f32.mrb[27].mxu0  ;;  %v4069_v18 = vpop.f32.mrb[27].mxu1 }
 0x2ed   : > { %v4129_v44 = vmax.f32 %v2277_v58, %v4069_v18 }
 0x2ee   : > { %4163 = vst.msk [vmem:[%s6987_s28 + $0xd8] sm:$0xff] %vm4135_vm7, %v4130_v55 }
 0x2ef   : > { %4162 = vst.msk [vmem:[%s6987_s28 + $0xd0] sm:$0xff] %vm4135_vm7, %v4129_v44  ;;  %v5041_v24 = vpop.f32.mrb[28].mxu0  ;;  %v5353_v10 = vpop.f32.mrb[28].mxu1 }
 0x2f0   : > { %v4132_v35 = vmax.f32 %v5041_v24, %v5353_v10  ;;  %v2289_v5 = vpop.f32.mrb[29].mxu0  ;;  %v4081_v41 = vpop.f32.mrb[29].mxu1 }
 0x2f1   : > { %v4131_v26 = vmax.f32 %v2289_v5, %v4081_v41 }
 0x2f2   : > { %4165 = vst.msk [vmem:[%s6987_s28 + $0xe8] sm:$0xff] %vm4135_vm7, %v4132_v35 }
 0x2f3   : > { %4164 = vst.msk [vmem:[%s6987_s28 + $0xe0] sm:$0xff] %vm4135_vm7, %v4131_v26  ;;  %v5044_v56 = vpop.f32.mrb[30].mxu0  ;;  %v5356_v7 = vpop.f32.mrb[30].mxu1 }
 0x2f4   : > { %v4134_v27 = vmax.f32 %v5044_v56, %v5356_v7  ;;  %v2301_v19 = vpop.f32.mrb[31].mxu0  ;;  %v4093_v49 = vpop.f32.mrb[31].mxu1 }
 0x2f5   : > { %v4133_v17 = vmax.f32 %v2301_v19, %v4093_v49 }
 0x2f6   : > { %4167 = vst.msk [vmem:[%s6987_s28 + $0xf8] sm:$0xff] %vm4135_vm7, %v4134_v27 }
 0x2f7   : > { %4166 = vst.msk [vmem:[%s6987_s28 + $0xf0] sm:$0xff] %vm4135_vm7, %v4133_v17 }
 0x2f8   : > { %5798 = shalt.err (!%p5795_p5)
}
 0x2f9   : > { %s5799_s17 = scalar_lea.hbm %s7054_s4, 4096  ;;  %s5803_s22 = scalar_lea.hbm %s7111_s1, 8192 }
 0x2fa   : > { %p5800_p6 = scmp.ne.s32.totalorder %s7054_s4, %s5799_s17  ;;  %p5804_p10 = scmp.lt.u32.totalorder %s7054_s4, %s7111_s1 }
 0x2fb   : > { %p5805_p11 = scmp.lt.u32.totalorder %s5803_s22, %s5799_s17  ;;  %p5807_p13 = scmp.lt.u32.totalorder %s5799_s17, %s7054_s4 }
 0x2fc   : > { %p5801_p7 = pnand %p5800_p6, %p5921_p4 }
 0x2fd   : > { %p5806_p12 = por %p5805_p11, %p5804_p10 }
 0x2fe   : > { %p5802_p9 = pneg %p5801_p7 }
 0x2ff   : > { %p5808_p0 = por %p5807_p13, %p5806_p12 }
 0x301   : > { %p5809_p1 = pnand %p5808_p0, %p5802_p9 }
 0x303   : > { %5812 = shalt.err (!%p5809_p1)
}
 0x304   : > { %s5869_s25 = smov 128   ;;  %s5870_s26 = smov 8  }
 0x305   : > { %5725 = dma.vmem_to_hbm [thread:$0]  (%p5921_p4), %s7056_s30, 4096, %s7054_s4, %s7064_s5, %s5869_s25, %s5869_s25, %s5870_s26  }
 0x306 PF: > { %p5731_p2 = scmp.ge.s32.totalorder %s5863_s11, 2  ;;  %s4198_s27 = sand.u32 1, %s5843_s6  }
 0x307   : > { %s4199_s28 = scalar_lea.sflag [#allocation3], %s4198_s27 }
 0x308   : > { %p5728_p3 = pnand %p5731_p2, %p5928_p8 }
 0x30a   : > { %5838 = dma.done.wait (!%p5728_p3), %s4199_s28, 4096  }
 0x30b   : > { %5840 = vsyncadd (!%p5728_p3), %s4199_s28, 4294963200  ;;  %s14_s11 = sadd.s32 1, %s5863_s11   ;;  %s7321_s6 = smov %s5847_s7 }
 0x30c   : > { %p11_p5 = scmp.ge.s32.totalorder %s14_s11, 4   ;;  %s7322_s7 = smov %s5851_s8 }
 0x30d   : > { %s7323_s8 = smov %s5934_s19  ;;  %s7324_s9 = smov %s5859_s10 }
 0x30e   : > { %s7325_s10 = smov %s7327_s14  ;;  %13 = sbr.rel (!%p11_p5) target bundleno = 4 (0x4), region = 60 }
 0x315   :  { %4204 = vsyncpa [#allocation3], 1 }
 0x316   :  { %4206 = vsyncpa [#allocation3 + $0x1], 1 }

</bundles_post_ra>
